<compile_context>
chip_gen: v7x
topology: tpu7x:2x2x1
jax: 0.10.0
libtpu: 0.0.40
codegen_flags: <defaults>
</compile_context>

<pallas_src>
import functools
import math

import jax
import jax.numpy as jnp
from jax import lax
from jax.experimental import pallas as pl
from jax.experimental.pallas import tpu as pltpu

MIN_NORM = 1e-15
MIN_NORM_SQ = MIN_NORM * MIN_NORM
PROJ_EPS = 4e-3                       # float32 boundary eps (hgcn PoincareBall.proj)
ATANH_BOUND = math.atanh(1.0 - PROJ_EPS)
ATANH_CLAMP = 1.0 - 1e-7
LANE = 128                            # TPU lane width; feature dims zero-padded to this
SUBLANE = 8
MXU_DTYPE = jnp.float32               # TODO(synk): jnp.bfloat16 on v6e/v7x at realistic N


# ----------------------------------------------------------------------------
# Exact Poincare-ball helpers (host side: history init, bias fold).
# ----------------------------------------------------------------------------
def _artanh(x):
    x = jnp.clip(x, -ATANH_CLAMP, ATANH_CLAMP)
    return 0.5 * jnp.log((1.0 + x) / (1.0 - x))     # one log instead of two


def _norm_last(x):
    return jnp.maximum(jnp.sqrt(jnp.sum(x * x, axis=-1, keepdims=True)), MIN_NORM)


def host_proj(x, c):
    norm = _norm_last(x)
    maxnorm = (1.0 - PROJ_EPS) / math.sqrt(c)
    return jnp.where(norm > maxnorm, x / norm * maxnorm, x)


def host_expmap0(u, c):
    sc = math.sqrt(c)
    un = _norm_last(u)
    return jnp.tanh(sc * un) * u / (sc * un)


def host_logmap0(p, c):
    sc = math.sqrt(c)
    pn = _norm_last(p)
    return _artanh(sc * pn) * p / (sc * pn)


# ----------------------------------------------------------------------------
# In-kernel helpers.
# ----------------------------------------------------------------------------
def _mm(a, b):
    return jnp.dot(a.astype(MXU_DTYPE), b.astype(MXU_DTYPE),
                   preferred_element_type=jnp.float32)


def _sumsq_invnorm(x):
    # one cross-lane reduction + one rsqrt (EUP) per norm site
    ss = jnp.sum(x * x, axis=-1, keepdims=True)
    return ss, lax.rsqrt(jnp.maximum(ss, MIN_NORM_SQ))


def _tan_clip(v, c):
    # == logmap0(proj(expmap0(v, c), c), c): clip tangent norm at artanh(1-eps)/sqrt(c)
    _, inv = _sumsq_invnorm(v)
    return v * jnp.minimum(1.0, (ATANH_BOUND / math.sqrt(c)) * inv)


# ----------------------------------------------------------------------------
# Single fused forward kernel.  All tensors live in VMEM for the whole call.
# ----------------------------------------------------------------------------
def _hgwavenet_kernel(x_ref, adj_ref, ws1_ref, bs1_ref, ws2_ref, bs2_ref,
                      hist_ref, wt_ref, bt_ref,
                      wih_ref, whh_ref, bih_ref, bhh_ref,
                      wl_ref, hyp_bias_ref, o_ref, *,
                      c, c_out, npad, window, kernel_size, depth, nout, ch):
    sqrt_c = math.sqrt(c_out)
    inv_sqrt_c = 1.0 / sqrt_c
    adj = adj_ref[...]

    # ---- spatial dilated graph conv (2 HGCN-style layers), tangent space ----
    h = _mm(adj, _mm(x_ref[...], ws1_ref[...])) + bs1_ref[...]
    h = _tan_clip(jnp.maximum(h, 0.0), c)          # layer1-out -> layer2-in round trip
    h = _mm(adj, _mm(h, ws2_ref[...])) + bs2_ref[...]
    xg = _tan_clip(jnp.maximum(h, 0.0), c_out)     # == to_tangent(spatial output)

    # ---- temporal dilated causal conv: receptive field of the last step only -
    # taps are contiguous, sublane-aligned row slices (no zero-fill needed since
    # window == kernel_size**depth); the k taps are lane-packed into one
    # 128-lane block with pltpu.roll -> one MXU pass per layer.
    cur = hist_ref[...]                            # (window*npad, ch), tangent space
    length = window
    for layer in range(depth):
        dil = kernel_size ** layer
        out_len = length - (kernel_size - 1) * dil
        rows = out_len * npad
        top = (kernel_size - 1) * dil * npad
        packed = cur[top:top + rows, :]            # tap j = 0 (current timestep)
        for j in range(1, kernel_size):
            start = (kernel_size - 1 - j) * dil * npad
            packed = packed + pltpu.roll(cur[start:start + rows, :], j * nout, 1)
        cur = _mm(packed, wt_ref[layer]) + bt_ref[layer]
        if layer < depth - 1:
            cur = jnp.maximum(cur, 0.0)            # tangent-space ReLU
        length = out_len
    hg = _tan_clip(cur, c_out)                     # (npad, ch), == to_tangent(temporal[-1])

    # ---- GRU cell (each gate in its own 128-lane block -> aligned slices) ----
    gi = _mm(xg, wih_ref[...]) + bih_ref[...]
    gh = _mm(hg, whh_ref[...]) + bhh_ref[...]
    i_r, i_z, i_n = gi[:, :ch], gi[:, ch:2 * ch], gi[:, 2 * ch:]
    h_r, h_z, h_n = gh[:, :ch], gh[:, ch:2 * ch], gh[:, 2 * ch:]
    r = jax.nn.sigmoid(i_r + h_r)
    z = jax.nn.sigmoid(i_z + h_z)
    n = jnp.tanh(i_n + r * h_n)
    g = (1.0 - z) * n + z * hg

    # ---- to_hyper, with proj fused via the analytic expmap0 output norm ------
    gss, g_inv = _sumsq_invnorm(g)
    g_norm = jnp.maximum(gss * g_inv, MIN_NORM)
    t = jnp.minimum(jnp.tanh(sqrt_c * g_norm), 1.0 - PROJ_EPS)
    xh = g * (t * g_inv * inv_sqrt_c)              # proj(expmap0(g)) without re-norm
    x_norm = jnp.maximum(t * inv_sqrt_c, MIN_NORM)

    # ---- HypLinear: mobius matvec + mobius bias add (bias pre-folded on host) -
    mx = _mm(xh, wl_ref[...])
    mss, m_inv = _sumsq_invnorm(mx)
    mx_norm = jnp.maximum(mss * m_inv, MIN_NORM)
    res = (jnp.tanh((mx_norm / x_norm) * _artanh(sqrt_c * x_norm))
           * mx * (m_inv * inv_sqrt_c))
    res = jnp.where(mss <= MIN_NORM_SQ, 0.0, res)  # reuse ||mx||^2 for the zero-row guard
    # proj(res)
    rss, r_inv = _sumsq_invnorm(res)
    maxnorm = (1.0 - PROJ_EPS) * inv_sqrt_c
    res = jnp.where(rss * r_inv > maxnorm, res * (r_inv * maxnorm), res)
    # mobius_add(res, hyp_bias) with exact division on the denominator
    bias = hyp_bias_ref[...]
    x2 = jnp.sum(res * res, axis=-1, keepdims=True)
    y2 = jnp.sum(bias * bias, axis=-1, keepdims=True)
    xy = jnp.sum(res * bias, axis=-1, keepdims=True)
    num = (1.0 + 2.0 * c_out * xy + c_out * y2) * res + (1.0 - c_out * x2) * bias
    den = 1.0 + 2.0 * c_out * xy + (c_out * c_out) * x2 * y2
    out = num * (1.0 / jnp.maximum(den, MIN_NORM))
    # final proj
    oss, o_inv = _sumsq_invnorm(out)
    out = jnp.where(oss * o_inv > maxnorm, out * (o_inv * maxnorm), out)
    o_ref[...] = out


# ----------------------------------------------------------------------------
# One-time host-side packing / padding (padded lanes stay exactly zero).
# ----------------------------------------------------------------------------
def _round_up(n, m):
    return ((n + m - 1) // m) * m


def _pad2(a, rows, cols):
    a = jnp.asarray(a, jnp.float32)
    return jnp.pad(a, ((0, rows - a.shape[0]), (0, cols - a.shape[1])))


def _pad_gru_w(w, nh, cp):
    # (nin, 3*nh) -> (cp, 3*cp): each gate gets its own 128-lane block.
    nin = w.shape[0]
    out = jnp.zeros((cp, 3 * cp), jnp.float32)
    for g in range(3):
        out = out.at[:nin, g * cp:g * cp + nh].set(w[:, g * nh:(g + 1) * nh])
    return out


def _pad_gru_b(b, nh, cp):
    out = jnp.zeros((1, 3 * cp), jnp.float32)
    for g in range(3):
        out = out.at[:, g * cp:g * cp + nh].set(b[:, g * nh:(g + 1) * nh])
    return out


def _pack_temporal_w(w, nout, cp):
    # (k, nout, nout) -> (cp, cp): tap j's weights at input lanes [j*nout,(j+1)*nout),
    # so each temporal layer is ONE (rows, 128) @ (128, 128) matmul.
    k = w.shape[0]
    out = jnp.zeros((cp, cp), jnp.float32)
    for j in range(k):
        out = out.at[j * nout:(j + 1) * nout, :nout].set(w[j])
    return out


def prepare_inputs(params, adj, history, *, c_out):
    """One-time parameter / state packing (hoisted out of the jitted forward)."""
    num_nodes = adj.shape[0]
    window, hist_nodes, nout = history.shape
    assert hist_nodes == num_nodes
    kernel_size = params["w_t"][0].shape[0]
    depth = len(params["w_t"])
    assert window == kernel_size ** depth, "window must equal kernel_size**depth"
    cp = LANE
    assert kernel_size * nout <= cp, "temporal taps must pack into one 128-lane block"
    npad = _round_up(num_nodes, SUBLANE)

    prep = {
        "adj": _pad2(adj, npad, npad),
        "ws1": _pad2(params["w_s1"], cp, cp),
        "bs1": _pad2(params["b_s1"], 1, cp),
        "ws2": _pad2(params["w_s2"], cp, cp),
        "bs2": _pad2(params["b_s2"], 1, cp),
        "wt": jnp.stack([_pack_temporal_w(w, nout, cp) for w in params["w_t"]]),
        "bt": jnp.stack([_pad2(b, 1, cp) for b in params["b_t"]]),
        "wih": _pad_gru_w(params["w_ih"], nout, cp),
        "whh": _pad_gru_w(params["w_hh"], nout, cp),
        "bih": _pad_gru_b(params["b_ih"], nout, cp),
        "bhh": _pad_gru_b(params["b_hh"], nout, cp),
        "wl": _pad2(params["w_l"], cp, cp),
        # HypLinear hyperbolic bias is parameter-only math -> fold here.
        "hyp_bias": _pad2(host_proj(host_expmap0(params["b_l"], c_out), c_out), 1, cp),
    }
    # History: hyperbolic (T, N, nout) -> tangent space once, per-timestep row
    # padding to a sublane multiple, flattened to (T*npad, 128).
    hist_tan = host_logmap0(jnp.asarray(history, jnp.float32), c_out)
    hist_p = jnp.zeros((window, npad, cp), jnp.float32)
    hist_p = hist_p.at[:, :num_nodes, :nout].set(hist_tan)
    prep["hist"] = hist_p.reshape(window * npad, cp)
    return prep


def make_forward(*, num_nodes, nout, window, kernel_size, depth, c, c_out):
    cp = LANE
    npad = _round_up(num_nodes, SUBLANE)
    kern = functools.partial(
        _hgwavenet_kernel, c=c, c_out=c_out, npad=npad, window=window,
        kernel_size=kernel_size, depth=depth, nout=nout, ch=cp)
    vmem = pl.BlockSpec(memory_space=pltpu.MemorySpace.VMEM)
    call = pl.pallas_call(
        kern,
        in_specs=[vmem] * 15,
        out_specs=vmem,
        out_shape=jax.ShapeDtypeStruct((npad, cp), jnp.float32),
    )

    @jax.jit
    def forward(prep, x):
        x_p = jnp.pad(x.astype(jnp.float32),
                      ((0, npad - x.shape[0]), (0, cp - x.shape[1])))
        out_p = call(x_p, prep["adj"], prep["ws1"], prep["bs1"], prep["ws2"],
                     prep["bs2"], prep["hist"], prep["wt"], prep["bt"],
                     prep["wih"], prep["whh"], prep["bih"], prep["bhh"],
                     prep["wl"], prep["hyp_bias"])
        return out_p[:num_nodes, :nout]

    return forward


# ----------------------------------------------------------------------------
# Glue: parameter init, adjacency construction.
# ----------------------------------------------------------------------------
def glorot(key, shape):
    fan_in = shape[-2] if len(shape) >= 2 else shape[-1]
    fan_out = shape[-1]
    limit = (6.0 / (fan_in + fan_out)) ** 0.5
    return jax.random.uniform(key, shape, jnp.float32, -limit, limit)


def build_dense_adj(dilated_edge_index, num_nodes):
    """Combine dilated edge lists into one row-normalized dense adjacency."""
    a = jnp.zeros((num_nodes, num_nodes), jnp.float32)
    for ei in dilated_edge_index:
        src, dst = ei[0], ei[1]
        a = a.at[dst, src].set(1.0)
    a = jnp.minimum(a + jnp.eye(num_nodes, dtype=jnp.float32), 1.0)  # self loops
    deg = jnp.sum(a, axis=1, keepdims=True)
    return a / jnp.maximum(deg, 1.0)


def init_params(key, *, num_nodes, nfeat, nhid, nout, kernel_size, depth):
    keys = jax.random.split(key, 16)
    params = {
        "w_s1": glorot(keys[0], (nfeat, nhid)),
        "b_s1": jnp.zeros((1, nhid), jnp.float32),
        "w_s2": glorot(keys[1], (nhid, nout)),
        "b_s2": jnp.zeros((1, nout), jnp.float32),
        "w_t": [glorot(keys[2 + i], (kernel_size, nout, nout)) for i in range(depth)],
        "b_t": [jnp.zeros((1, nout), jnp.float32) for _ in range(depth)],
        "w_ih": glorot(keys[8], (nout, 3 * nout)),
        "w_hh": glorot(keys[9], (nout, 3 * nout)),
        "b_ih": jnp.zeros((1, 3 * nout), jnp.float32),
        "b_hh": jnp.zeros((1, 3 * nout), jnp.float32),
        "w_l": glorot(keys[10], (nout, nout)),
        "b_l": glorot(keys[11], (1, nout)),
        # Q / r are only used by aggregate_history (not in forward); kept for parity.
        "Q": glorot(keys[12], (nout, nhid)),
        "r": glorot(keys[13], (nhid, 1)),
        "history_initial": glorot(keys[14], (num_nodes, nout)),
    }
    return params


if __name__ == "__main__":
    # Small, deterministic configuration.
    num_nodes, nfeat, nhid, nout = 16, 8, 16, 8
    kernel_size, depth = 2, 3
    window_size = kernel_size ** depth              # 8
    c = 1.0
    c_out = 1.0                                     # curvature of spatial conv output

    key = jax.random.PRNGKey(0)
    k_par, k_x = jax.random.split(key)
    params = init_params(k_par, num_nodes=num_nodes, nfeat=nfeat, nhid=nhid,
                         nout=nout, kernel_size=kernel_size, depth=depth)

    # dilated_edge_index: ring edges at dilations 1 and 2 (list of [2, E] int arrays).
    idx = jnp.arange(num_nodes, dtype=jnp.int32)
    edges_d1 = jnp.stack([idx, (idx + 1) % num_nodes])
    edges_d2 = jnp.stack([idx, (idx + 2) % num_nodes])
    adj = build_dense_adj([edges_d1, edges_d2], num_nodes)

    # Node features.
    x = jax.random.normal(k_x, (num_nodes, nfeat), jnp.float32) * 0.1

    # init_history(): map history_initial to the Poincare ball, replicate window_size times.
    hist_hyp = host_proj(host_expmap0(params["history_initial"], c_out), c_out)
    history = jnp.tile(hist_hyp[None], (window_size, 1, 1))   # [window, N, nout]

    prep = prepare_inputs(params, adj, history, c_out=c_out)
    fwd = make_forward(num_nodes=num_nodes, nout=nout, window=window_size,
                       kernel_size=kernel_size, depth=depth, c=c, c_out=c_out)

    out = jax.block_until_ready(fwd(prep, x))

    assert out.shape == (num_nodes, nout), out.shape
    assert bool(jnp.all(jnp.isfinite(out)))
    # Result must lie inside the Poincare ball of curvature c_out.
    assert bool(jnp.all(jnp.sum(out * out, axis=-1) < 1.0 / c_out))
    print("KERNEL_OK")
</pallas_src>

<mosaic_0001>
module attributes {stable_mosaic.version = 11 : i64} {
  func.func @_hgwavenet_kernel(%arg0: memref<16x128xf32, #tpu.memory_space<vmem>>, %arg1: memref<16x16xf32, #tpu.memory_space<vmem>>, %arg2: memref<128x128xf32, #tpu.memory_space<vmem>>, %arg3: memref<1x128xf32, #tpu.memory_space<vmem>>, %arg4: memref<128x128xf32, #tpu.memory_space<vmem>>, %arg5: memref<1x128xf32, #tpu.memory_space<vmem>>, %arg6: memref<128x128xf32, #tpu.memory_space<vmem>>, %arg7: memref<3x128x128xf32, #tpu.memory_space<vmem>>, %arg8: memref<3x1x128xf32, #tpu.memory_space<vmem>>, %arg9: memref<128x384xf32, #tpu.memory_space<vmem>>, %arg10: memref<128x384xf32, #tpu.memory_space<vmem>>, %arg11: memref<1x384xf32, #tpu.memory_space<vmem>>, %arg12: memref<1x384xf32, #tpu.memory_space<vmem>>, %arg13: memref<128x128xf32, #tpu.memory_space<vmem>>, %arg14: memref<1x128xf32, #tpu.memory_space<vmem>>, %arg15: memref<16x128xf32, #tpu.memory_space<vmem>>) attributes {dimension_semantics = [], scalar_prefetch = 0 : i64, scratch_operands = 0 : i64, tpu.core_type = #tpu.core_type<tc>} {
    %c0 = arith.constant 0 : index
    %c0_0 = arith.constant 0 : index
    %0 = vector.load %arg1[%c0, %c0_0] : memref<16x16xf32, #tpu.memory_space<vmem>>, vector<16x16xf32>
    %c0_1 = arith.constant 0 : index
    %c0_2 = arith.constant 0 : index
    %1 = vector.load %arg0[%c0_1, %c0_2] : memref<16x128xf32, #tpu.memory_space<vmem>>, vector<16x128xf32>
    %c0_3 = arith.constant 0 : index
    %c0_4 = arith.constant 0 : index
    %2 = vector.load %arg2[%c0_3, %c0_4] : memref<128x128xf32, #tpu.memory_space<vmem>>, vector<128x128xf32>
    %cst = arith.constant dense<0.000000e+00> : vector<16x128xf32>
    %3 = tpu.matmul %1, %2, %cst {dimension_numbers = #tpu.dot_dimension_numbers<[1], [0], [0], [1], [0, 0, 1, 1], [], []>} : vector<16x128xf32>, vector<128x128xf32>, vector<16x128xf32> -> vector<16x128xf32>
    %cst_5 = arith.constant dense<0.000000e+00> : vector<16x128xf32>
    %4 = tpu.matmul %0, %3, %cst_5 {dimension_numbers = #tpu.dot_dimension_numbers<[1], [0], [0], [1], [0, 0, 1, 1], [], []>} : vector<16x16xf32>, vector<16x128xf32>, vector<16x128xf32> -> vector<16x128xf32>
    %c0_6 = arith.constant 0 : index
    %c0_7 = arith.constant 0 : index
    %5 = vector.load %arg3[%c0_6, %c0_7] : memref<1x128xf32, #tpu.memory_space<vmem>>, vector<1x128xf32>
    %6 = vector.broadcast %5 : vector<1x128xf32> to vector<16x128xf32>
    %7 = arith.addf %4, %6 : vector<16x128xf32>
    %cst_8 = arith.constant 0.000000e+00 : f32
    %8 = vector.broadcast %cst_8 : f32 to vector<16x128xf32>
    %9 = arith.maximumf %7, %8 : vector<16x128xf32>
    %10 = arith.mulf %9, %9 : vector<16x128xf32>
    %cst_9 = arith.constant dense<0.000000e+00> : vector<16xf32>
    %11 = vector.multi_reduction <add>, %10, %cst_9 [1] : vector<16x128xf32> to vector<16xf32>
    %12 = vector.shape_cast %11 : vector<16xf32> to vector<16x1xf32>
    %cst_10 = arith.constant 1.000000e-30 : f32
    %13 = vector.broadcast %cst_10 : f32 to vector<16x1xf32>
    %14 = arith.maximumf %12, %13 : vector<16x1xf32>
    %15 = math.rsqrt %14 : vector<16x1xf32>
    %cst_11 = arith.constant 3.10630298 : f32
    %16 = vector.broadcast %cst_11 : f32 to vector<16x1xf32>
    %17 = arith.mulf %16, %15 : vector<16x1xf32>
    %cst_12 = arith.constant 1.000000e+00 : f32
    %18 = vector.broadcast %cst_12 : f32 to vector<16x1xf32>
    %19 = arith.minimumf %18, %17 : vector<16x1xf32>
    %20 = vector.broadcast %19 : vector<16x1xf32> to vector<16x128xf32>
    %21 = arith.mulf %9, %20 : vector<16x128xf32>
    %c0_13 = arith.constant 0 : index
    %c0_14 = arith.constant 0 : index
    %22 = vector.load %arg4[%c0_13, %c0_14] : memref<128x128xf32, #tpu.memory_space<vmem>>, vector<128x128xf32>
    %cst_15 = arith.constant dense<0.000000e+00> : vector<16x128xf32>
    %23 = tpu.matmul %21, %22, %cst_15 {dimension_numbers = #tpu.dot_dimension_numbers<[1], [0], [0], [1], [0, 0, 1, 1], [], []>} : vector<16x128xf32>, vector<128x128xf32>, vector<16x128xf32> -> vector<16x128xf32>
    %cst_16 = arith.constant dense<0.000000e+00> : vector<16x128xf32>
    %24 = tpu.matmul %0, %23, %cst_16 {dimension_numbers = #tpu.dot_dimension_numbers<[1], [0], [0], [1], [0, 0, 1, 1], [], []>} : vector<16x16xf32>, vector<16x128xf32>, vector<16x128xf32> -> vector<16x128xf32>
    %c0_17 = arith.constant 0 : index
    %c0_18 = arith.constant 0 : index
    %25 = vector.load %arg5[%c0_17, %c0_18] : memref<1x128xf32, #tpu.memory_space<vmem>>, vector<1x128xf32>
    %26 = vector.broadcast %25 : vector<1x128xf32> to vector<16x128xf32>
    %27 = arith.addf %24, %26 : vector<16x128xf32>
    %cst_19 = arith.constant 0.000000e+00 : f32
    %28 = vector.broadcast %cst_19 : f32 to vector<16x128xf32>
    %29 = arith.maximumf %27, %28 : vector<16x128xf32>
    %30 = arith.mulf %29, %29 : vector<16x128xf32>
    %cst_20 = arith.constant dense<0.000000e+00> : vector<16xf32>
    %31 = vector.multi_reduction <add>, %30, %cst_20 [1] : vector<16x128xf32> to vector<16xf32>
    %32 = vector.shape_cast %31 : vector<16xf32> to vector<16x1xf32>
    %cst_21 = arith.constant 1.000000e-30 : f32
    %33 = vector.broadcast %cst_21 : f32 to vector<16x1xf32>
    %34 = arith.maximumf %32, %33 : vector<16x1xf32>
    %35 = math.rsqrt %34 : vector<16x1xf32>
    %cst_22 = arith.constant 3.10630298 : f32
    %36 = vector.broadcast %cst_22 : f32 to vector<16x1xf32>
    %37 = arith.mulf %36, %35 : vector<16x1xf32>
    %cst_23 = arith.constant 1.000000e+00 : f32
    %38 = vector.broadcast %cst_23 : f32 to vector<16x1xf32>
    %39 = arith.minimumf %38, %37 : vector<16x1xf32>
    %40 = vector.broadcast %39 : vector<16x1xf32> to vector<16x128xf32>
    %41 = arith.mulf %29, %40 : vector<16x128xf32>
    %c0_24 = arith.constant 0 : index
    %c0_25 = arith.constant 0 : index
    %42 = vector.load %arg6[%c0_24, %c0_25] : memref<128x128xf32, #tpu.memory_space<vmem>>, vector<128x128xf32>
    %43 = vector.extract_strided_slice %42 {offsets = [16, 0], sizes = [112, 128], strides = [1, 1]} : vector<128x128xf32> to vector<112x128xf32>
    %44 = vector.extract_strided_slice %42 {offsets = [0, 0], sizes = [112, 128], strides = [1, 1]} : vector<128x128xf32> to vector<112x128xf32>
    %c8_i32 = arith.constant 8 : i32
    %45 = tpu.dynamic_rotate %44 by %c8_i32 dim 1 : vector<112x128xf32>, i32 -> vector<112x128xf32>
    %46 = arith.addf %43, %45 : vector<112x128xf32>
    %c0_26 = arith.constant 0 : index
    %c0_27 = arith.constant 0 : index
    %c0_28 = arith.constant 0 : index
    %47 = vector.load %arg7[%c0_26, %c0_27, %c0_28] : memref<3x128x128xf32, #tpu.memory_space<vmem>>, vector<1x128x128xf32>
    %48 = vector.shape_cast %47 : vector<1x128x128xf32> to vector<128x128xf32>
    %cst_29 = arith.constant dense<0.000000e+00> : vector<112x128xf32>
    %49 = tpu.matmul %46, %48, %cst_29 {dimension_numbers = #tpu.dot_dimension_numbers<[1], [0], [0], [1], [0, 0, 1, 1], [], []>} : vector<112x128xf32>, vector<128x128xf32>, vector<112x128xf32> -> vector<112x128xf32>
    %c0_30 = arith.constant 0 : index
    %c0_31 = arith.constant 0 : index
    %c0_32 = arith.constant 0 : index
    %50 = vector.load %arg8[%c0_30, %c0_31, %c0_32] : memref<3x1x128xf32, #tpu.memory_space<vmem>>, vector<1x1x128xf32>
    %51 = vector.shape_cast %50 : vector<1x1x128xf32> to vector<1x128xf32>
    %52 = vector.broadcast %51 : vector<1x128xf32> to vector<112x128xf32>
    %53 = arith.addf %49, %52 : vector<112x128xf32>
    %cst_33 = arith.constant 0.000000e+00 : f32
    %54 = vector.broadcast %cst_33 : f32 to vector<112x128xf32>
    %55 = arith.maximumf %53, %54 : vector<112x128xf32>
    %56 = vector.extract_strided_slice %55 {offsets = [32, 0], sizes = [80, 128], strides = [1, 1]} : vector<112x128xf32> to vector<80x128xf32>
    %57 = vector.extract_strided_slice %55 {offsets = [0, 0], sizes = [80, 128], strides = [1, 1]} : vector<112x128xf32> to vector<80x128xf32>
    %c8_i32_34 = arith.constant 8 : i32
    %58 = tpu.dynamic_rotate %57 by %c8_i32_34 dim 1 : vector<80x128xf32>, i32 -> vector<80x128xf32>
    %59 = arith.addf %56, %58 : vector<80x128xf32>
    %c1 = arith.constant 1 : index
    %c0_35 = arith.constant 0 : index
    %c0_36 = arith.constant 0 : index
    %60 = vector.load %arg7[%c1, %c0_35, %c0_36] : memref<3x128x128xf32, #tpu.memory_space<vmem>>, vector<1x128x128xf32>
    %61 = vector.shape_cast %60 : vector<1x128x128xf32> to vector<128x128xf32>
    %cst_37 = arith.constant dense<0.000000e+00> : vector<80x128xf32>
    %62 = tpu.matmul %59, %61, %cst_37 {dimension_numbers = #tpu.dot_dimension_numbers<[1], [0], [0], [1], [0, 0, 1, 1], [], []>} : vector<80x128xf32>, vector<128x128xf32>, vector<80x128xf32> -> vector<80x128xf32>
    %c1_38 = arith.constant 1 : index
    %c0_39 = arith.constant 0 : index
    %c0_40 = arith.constant 0 : index
    %63 = vector.load %arg8[%c1_38, %c0_39, %c0_40] : memref<3x1x128xf32, #tpu.memory_space<vmem>>, vector<1x1x128xf32>
    %64 = vector.shape_cast %63 : vector<1x1x128xf32> to vector<1x128xf32>
    %65 = vector.broadcast %64 : vector<1x128xf32> to vector<80x128xf32>
    %66 = arith.addf %62, %65 : vector<80x128xf32>
    %cst_41 = arith.constant 0.000000e+00 : f32
    %67 = vector.broadcast %cst_41 : f32 to vector<80x128xf32>
    %68 = arith.maximumf %66, %67 : vector<80x128xf32>
    %69 = vector.extract_strided_slice %68 {offsets = [64, 0], sizes = [16, 128], strides = [1, 1]} : vector<80x128xf32> to vector<16x128xf32>
    %70 = vector.extract_strided_slice %68 {offsets = [0, 0], sizes = [16, 128], strides = [1, 1]} : vector<80x128xf32> to vector<16x128xf32>
    %c8_i32_42 = arith.constant 8 : i32
    %71 = tpu.dynamic_rotate %70 by %c8_i32_42 dim 1 : vector<16x128xf32>, i32 -> vector<16x128xf32>
    %72 = arith.addf %69, %71 : vector<16x128xf32>
    %c2 = arith.constant 2 : index
    %c0_43 = arith.constant 0 : index
    %c0_44 = arith.constant 0 : index
    %73 = vector.load %arg7[%c2, %c0_43, %c0_44] : memref<3x128x128xf32, #tpu.memory_space<vmem>>, vector<1x128x128xf32>
    %74 = vector.shape_cast %73 : vector<1x128x128xf32> to vector<128x128xf32>
    %cst_45 = arith.constant dense<0.000000e+00> : vector<16x128xf32>
    %75 = tpu.matmul %72, %74, %cst_45 {dimension_numbers = #tpu.dot_dimension_numbers<[1], [0], [0], [1], [0, 0, 1, 1], [], []>} : vector<16x128xf32>, vector<128x128xf32>, vector<16x128xf32> -> vector<16x128xf32>
    %c2_46 = arith.constant 2 : index
    %c0_47 = arith.constant 0 : index
    %c0_48 = arith.constant 0 : index
    %76 = vector.load %arg8[%c2_46, %c0_47, %c0_48] : memref<3x1x128xf32, #tpu.memory_space<vmem>>, vector<1x1x128xf32>
    %77 = vector.shape_cast %76 : vector<1x1x128xf32> to vector<1x128xf32>
    %78 = vector.broadcast %77 : vector<1x128xf32> to vector<16x128xf32>
    %79 = arith.addf %75, %78 : vector<16x128xf32>
    %80 = arith.mulf %79, %79 : vector<16x128xf32>
    %cst_49 = arith.constant dense<0.000000e+00> : vector<16xf32>
    %81 = vector.multi_reduction <add>, %80, %cst_49 [1] : vector<16x128xf32> to vector<16xf32>
    %82 = vector.shape_cast %81 : vector<16xf32> to vector<16x1xf32>
    %cst_50 = arith.constant 1.000000e-30 : f32
    %83 = vector.broadcast %cst_50 : f32 to vector<16x1xf32>
    %84 = arith.maximumf %82, %83 : vector<16x1xf32>
    %85 = math.rsqrt %84 : vector<16x1xf32>
    %cst_51 = arith.constant 3.10630298 : f32
    %86 = vector.broadcast %cst_51 : f32 to vector<16x1xf32>
    %87 = arith.mulf %86, %85 : vector<16x1xf32>
    %cst_52 = arith.constant 1.000000e+00 : f32
    %88 = vector.broadcast %cst_52 : f32 to vector<16x1xf32>
    %89 = arith.minimumf %88, %87 : vector<16x1xf32>
    %90 = vector.broadcast %89 : vector<16x1xf32> to vector<16x128xf32>
    %91 = arith.mulf %79, %90 : vector<16x128xf32>
    %c0_53 = arith.constant 0 : index
    %c0_54 = arith.constant 0 : index
    %92 = vector.load %arg9[%c0_53, %c0_54] : memref<128x384xf32, #tpu.memory_space<vmem>>, vector<128x384xf32>
    %cst_55 = arith.constant dense<0.000000e+00> : vector<16x384xf32>
    %93 = tpu.matmul %41, %92, %cst_55 {dimension_numbers = #tpu.dot_dimension_numbers<[1], [0], [0], [1], [0, 0, 1, 1], [], []>} : vector<16x128xf32>, vector<128x384xf32>, vector<16x384xf32> -> vector<16x384xf32>
    %c0_56 = arith.constant 0 : index
    %c0_57 = arith.constant 0 : index
    %94 = vector.load %arg11[%c0_56, %c0_57] : memref<1x384xf32, #tpu.memory_space<vmem>>, vector<1x384xf32>
    %95 = vector.broadcast %94 : vector<1x384xf32> to vector<16x384xf32>
    %96 = arith.addf %93, %95 : vector<16x384xf32>
    %c0_58 = arith.constant 0 : index
    %c0_59 = arith.constant 0 : index
    %97 = vector.load %arg10[%c0_58, %c0_59] : memref<128x384xf32, #tpu.memory_space<vmem>>, vector<128x384xf32>
    %cst_60 = arith.constant dense<0.000000e+00> : vector<16x384xf32>
    %98 = tpu.matmul %91, %97, %cst_60 {dimension_numbers = #tpu.dot_dimension_numbers<[1], [0], [0], [1], [0, 0, 1, 1], [], []>} : vector<16x128xf32>, vector<128x384xf32>, vector<16x384xf32> -> vector<16x384xf32>
    %c0_61 = arith.constant 0 : index
    %c0_62 = arith.constant 0 : index
    %99 = vector.load %arg12[%c0_61, %c0_62] : memref<1x384xf32, #tpu.memory_space<vmem>>, vector<1x384xf32>
    %100 = vector.broadcast %99 : vector<1x384xf32> to vector<16x384xf32>
    %101 = arith.addf %98, %100 : vector<16x384xf32>
    %102 = vector.extract_strided_slice %96 {offsets = [0, 0], sizes = [16, 128], strides = [1, 1]} : vector<16x384xf32> to vector<16x128xf32>
    %103 = vector.extract_strided_slice %96 {offsets = [0, 128], sizes = [16, 128], strides = [1, 1]} : vector<16x384xf32> to vector<16x128xf32>
    %104 = vector.extract_strided_slice %96 {offsets = [0, 256], sizes = [16, 128], strides = [1, 1]} : vector<16x384xf32> to vector<16x128xf32>
    %105 = vector.extract_strided_slice %101 {offsets = [0, 0], sizes = [16, 128], strides = [1, 1]} : vector<16x384xf32> to vector<16x128xf32>
    %106 = vector.extract_strided_slice %101 {offsets = [0, 128], sizes = [16, 128], strides = [1, 1]} : vector<16x384xf32> to vector<16x128xf32>
    %107 = vector.extract_strided_slice %101 {offsets = [0, 256], sizes = [16, 128], strides = [1, 1]} : vector<16x384xf32> to vector<16x128xf32>
    %108 = arith.addf %102, %105 : vector<16x128xf32>
    %109 = arith.negf %108 : vector<16x128xf32>
    %110 = math.exp %109 : vector<16x128xf32>
    %cst_63 = arith.constant 1.000000e+00 : f32
    %111 = vector.broadcast %cst_63 : f32 to vector<16x128xf32>
    %112 = arith.addf %111, %110 : vector<16x128xf32>
    %113 = arith.divf %111, %112 : vector<16x128xf32>
    %114 = arith.addf %103, %106 : vector<16x128xf32>
    %115 = arith.negf %114 : vector<16x128xf32>
    %116 = math.exp %115 : vector<16x128xf32>
    %cst_64 = arith.constant 1.000000e+00 : f32
    %117 = vector.broadcast %cst_64 : f32 to vector<16x128xf32>
    %118 = arith.addf %117, %116 : vector<16x128xf32>
    %119 = arith.divf %117, %118 : vector<16x128xf32>
    %120 = arith.mulf %113, %107 : vector<16x128xf32>
    %121 = arith.addf %104, %120 : vector<16x128xf32>
    %122 = math.tanh %121 : vector<16x128xf32>
    %cst_65 = arith.constant 1.000000e+00 : f32
    %123 = vector.broadcast %cst_65 : f32 to vector<16x128xf32>
    %124 = arith.subf %123, %119 : vector<16x128xf32>
    %125 = arith.mulf %124, %122 : vector<16x128xf32>
    %126 = arith.mulf %119, %91 : vector<16x128xf32>
    %127 = arith.addf %125, %126 : vector<16x128xf32>
    %128 = arith.mulf %127, %127 : vector<16x128xf32>
    %cst_66 = arith.constant dense<0.000000e+00> : vector<16xf32>
    %129 = vector.multi_reduction <add>, %128, %cst_66 [1] : vector<16x128xf32> to vector<16xf32>
    %130 = vector.shape_cast %129 : vector<16xf32> to vector<16x1xf32>
    %cst_67 = arith.constant 1.000000e-30 : f32
    %131 = vector.broadcast %cst_67 : f32 to vector<16x1xf32>
    %132 = arith.maximumf %130, %131 : vector<16x1xf32>
    %133 = math.rsqrt %132 : vector<16x1xf32>
    %134 = arith.mulf %130, %133 : vector<16x1xf32>
    %cst_68 = arith.constant 1.000000e-15 : f32
    %135 = vector.broadcast %cst_68 : f32 to vector<16x1xf32>
    %136 = arith.maximumf %134, %135 : vector<16x1xf32>
    %cst_69 = arith.constant 1.000000e+00 : f32
    %137 = vector.broadcast %cst_69 : f32 to vector<16x1xf32>
    %138 = arith.mulf %137, %136 : vector<16x1xf32>
    %139 = math.tanh %138 : vector<16x1xf32>
    %cst_70 = arith.constant 0.995999991 : f32
    %140 = vector.broadcast %cst_70 : f32 to vector<16x1xf32>
    %141 = arith.minimumf %139, %140 : vector<16x1xf32>
    %142 = arith.mulf %141, %133 : vector<16x1xf32>
    %cst_71 = arith.constant 1.000000e+00 : f32
    %143 = vector.broadcast %cst_71 : f32 to vector<16x1xf32>
    %144 = arith.mulf %142, %143 : vector<16x1xf32>
    %145 = vector.broadcast %144 : vector<16x1xf32> to vector<16x128xf32>
    %146 = arith.mulf %127, %145 : vector<16x128xf32>
    %cst_72 = arith.constant 1.000000e+00 : f32
    %147 = vector.broadcast %cst_72 : f32 to vector<16x1xf32>
    %148 = arith.mulf %141, %147 : vector<16x1xf32>
    %cst_73 = arith.constant 1.000000e-15 : f32
    %149 = vector.broadcast %cst_73 : f32 to vector<16x1xf32>
    %150 = arith.maximumf %148, %149 : vector<16x1xf32>
    %c0_74 = arith.constant 0 : index
    %c0_75 = arith.constant 0 : index
    %151 = vector.load %arg13[%c0_74, %c0_75] : memref<128x128xf32, #tpu.memory_space<vmem>>, vector<128x128xf32>
    %cst_76 = arith.constant dense<0.000000e+00> : vector<16x128xf32>
    %152 = tpu.matmul %146, %151, %cst_76 {dimension_numbers = #tpu.dot_dimension_numbers<[1], [0], [0], [1], [0, 0, 1, 1], [], []>} : vector<16x128xf32>, vector<128x128xf32>, vector<16x128xf32> -> vector<16x128xf32>
    %153 = arith.mulf %152, %152 : vector<16x128xf32>
    %cst_77 = arith.constant dense<0.000000e+00> : vector<16xf32>
    %154 = vector.multi_reduction <add>, %153, %cst_77 [1] : vector<16x128xf32> to vector<16xf32>
    %155 = vector.shape_cast %154 : vector<16xf32> to vector<16x1xf32>
    %cst_78 = arith.constant 1.000000e-30 : f32
    %156 = vector.broadcast %cst_78 : f32 to vector<16x1xf32>
    %157 = arith.maximumf %155, %156 : vector<16x1xf32>
    %158 = math.rsqrt %157 : vector<16x1xf32>
    %159 = arith.mulf %155, %158 : vector<16x1xf32>
    %cst_79 = arith.constant 1.000000e-15 : f32
    %160 = vector.broadcast %cst_79 : f32 to vector<16x1xf32>
    %161 = arith.maximumf %159, %160 : vector<16x1xf32>
    %162 = arith.divf %161, %150 : vector<16x1xf32>
    %cst_80 = arith.constant 1.000000e+00 : f32
    %163 = vector.broadcast %cst_80 : f32 to vector<16x1xf32>
    %164 = arith.mulf %163, %150 : vector<16x1xf32>
    %cst_81 = arith.constant -0.99999988 : f32
    %cst_82 = arith.constant 0.99999988 : f32
    %165 = vector.broadcast %cst_81 : f32 to vector<16x1xf32>
    %166 = arith.maximumf %165, %164 : vector<16x1xf32>
    %167 = vector.broadcast %cst_82 : f32 to vector<16x1xf32>
    %168 = arith.minimumf %167, %166 : vector<16x1xf32>
    %cst_83 = arith.constant 1.000000e+00 : f32
    %169 = vector.broadcast %cst_83 : f32 to vector<16x1xf32>
    %170 = arith.addf %169, %168 : vector<16x1xf32>
    %cst_84 = arith.constant 1.000000e+00 : f32
    %171 = vector.broadcast %cst_84 : f32 to vector<16x1xf32>
    %172 = arith.subf %171, %168 : vector<16x1xf32>
    %173 = arith.divf %170, %172 : vector<16x1xf32>
    %174 = math.log %173 : vector<16x1xf32>
    %cst_85 = arith.constant 5.000000e-01 : f32
    %175 = vector.broadcast %cst_85 : f32 to vector<16x1xf32>
    %176 = arith.mulf %175, %174 : vector<16x1xf32>
    %177 = arith.mulf %162, %176 : vector<16x1xf32>
    %178 = math.tanh %177 : vector<16x1xf32>
    %179 = vector.broadcast %178 : vector<16x1xf32> to vector<16x128xf32>
    %180 = arith.mulf %179, %152 : vector<16x128xf32>
    %cst_86 = arith.constant 1.000000e+00 : f32
    %181 = vector.broadcast %cst_86 : f32 to vector<16x1xf32>
    %182 = arith.mulf %158, %181 : vector<16x1xf32>
    %183 = vector.broadcast %182 : vector<16x1xf32> to vector<16x128xf32>
    %184 = arith.mulf %180, %183 : vector<16x128xf32>
    %cst_87 = arith.constant 1.000000e-30 : f32
    %185 = vector.broadcast %cst_87 : f32 to vector<16x1xf32>
    %186 = arith.cmpf ole, %155, %185 : vector<16x1xf32>
    %cst_88 = arith.constant 0.000000e+00 : f32
    %187 = vector.shape_cast %186 : vector<16x1xi1> to vector<16x1xi1>
    %188 = vector.broadcast %187 : vector<16x1xi1> to vector<16x128xi1>
    %189 = vector.broadcast %cst_88 : f32 to vector<16x128xf32>
    %190 = arith.select %188, %189, %184 : vector<16x128xi1>, vector<16x128xf32>
    %191 = arith.mulf %190, %190 : vector<16x128xf32>
    %cst_89 = arith.constant dense<0.000000e+00> : vector<16xf32>
    %192 = vector.multi_reduction <add>, %191, %cst_89 [1] : vector<16x128xf32> to vector<16xf32>
    %193 = vector.shape_cast %192 : vector<16xf32> to vector<16x1xf32>
    %cst_90 = arith.constant 1.000000e-30 : f32
    %194 = vector.broadcast %cst_90 : f32 to vector<16x1xf32>
    %195 = arith.maximumf %193, %194 : vector<16x1xf32>
    %196 = math.rsqrt %195 : vector<16x1xf32>
    %197 = arith.mulf %193, %196 : vector<16x1xf32>
    %cst_91 = arith.constant 0.995999991 : f32
    %198 = vector.broadcast %cst_91 : f32 to vector<16x1xf32>
    %199 = arith.cmpf ogt, %197, %198 : vector<16x1xf32>
    %cst_92 = arith.constant 0.995999991 : f32
    %200 = vector.broadcast %cst_92 : f32 to vector<16x1xf32>
    %201 = arith.mulf %196, %200 : vector<16x1xf32>
    %202 = vector.broadcast %201 : vector<16x1xf32> to vector<16x128xf32>
    %203 = arith.mulf %190, %202 : vector<16x128xf32>
    %204 = vector.shape_cast %199 : vector<16x1xi1> to vector<16x1xi1>
    %205 = vector.broadcast %204 : vector<16x1xi1> to vector<16x128xi1>
    %206 = arith.select %205, %203, %190 : vector<16x128xi1>, vector<16x128xf32>
    %c0_93 = arith.constant 0 : index
    %c0_94 = arith.constant 0 : index
    %207 = vector.load %arg14[%c0_93, %c0_94] : memref<1x128xf32, #tpu.memory_space<vmem>>, vector<1x128xf32>
    %208 = arith.mulf %206, %206 : vector<16x128xf32>
    %cst_95 = arith.constant dense<0.000000e+00> : vector<16xf32>
    %209 = vector.multi_reduction <add>, %208, %cst_95 [1] : vector<16x128xf32> to vector<16xf32>
    %210 = vector.shape_cast %209 : vector<16xf32> to vector<16x1xf32>
    %211 = arith.mulf %207, %207 : vector<1x128xf32>
    %cst_96 = arith.constant dense<0.000000e+00> : vector<1xf32>
    %212 = vector.multi_reduction <add>, %211, %cst_96 [1] : vector<1x128xf32> to vector<1xf32>
    %213 = vector.shape_cast %212 : vector<1xf32> to vector<1x1xf32>
    %214 = vector.broadcast %207 : vector<1x128xf32> to vector<16x128xf32>
    %215 = arith.mulf %206, %214 : vector<16x128xf32>
    %cst_97 = arith.constant dense<0.000000e+00> : vector<16xf32>
    %216 = vector.multi_reduction <add>, %215, %cst_97 [1] : vector<16x128xf32> to vector<16xf32>
    %217 = vector.shape_cast %216 : vector<16xf32> to vector<16x1xf32>
    %cst_98 = arith.constant 2.000000e+00 : f32
    %218 = vector.broadcast %cst_98 : f32 to vector<16x1xf32>
    %219 = arith.mulf %218, %217 : vector<16x1xf32>
    %cst_99 = arith.constant 1.000000e+00 : f32
    %220 = vector.broadcast %cst_99 : f32 to vector<16x1xf32>
    %221 = arith.addf %220, %219 : vector<16x1xf32>
    %cst_100 = arith.constant 1.000000e+00 : f32
    %222 = vector.broadcast %cst_100 : f32 to vector<1x1xf32>
    %223 = arith.mulf %222, %213 : vector<1x1xf32>
    %224 = vector.broadcast %223 : vector<1x1xf32> to vector<16x1xf32>
    %225 = arith.addf %221, %224 : vector<16x1xf32>
    %226 = vector.broadcast %225 : vector<16x1xf32> to vector<16x128xf32>
    %227 = arith.mulf %226, %206 : vector<16x128xf32>
    %cst_101 = arith.constant 1.000000e+00 : f32
    %228 = vector.broadcast %cst_101 : f32 to vector<16x1xf32>
    %229 = arith.mulf %228, %210 : vector<16x1xf32>
    %cst_102 = arith.constant 1.000000e+00 : f32
    %230 = vector.broadcast %cst_102 : f32 to vector<16x1xf32>
    %231 = arith.subf %230, %229 : vector<16x1xf32>
    %232 = vector.broadcast %231 : vector<16x1xf32> to vector<16x128xf32>
    %233 = vector.broadcast %207 : vector<1x128xf32> to vector<16x128xf32>
    %234 = arith.mulf %232, %233 : vector<16x128xf32>
    %235 = arith.addf %227, %234 : vector<16x128xf32>
    %cst_103 = arith.constant 2.000000e+00 : f32
    %236 = vector.broadcast %cst_103 : f32 to vector<16x1xf32>
    %237 = arith.mulf %236, %217 : vector<16x1xf32>
    %cst_104 = arith.constant 1.000000e+00 : f32
    %238 = vector.broadcast %cst_104 : f32 to vector<16x1xf32>
    %239 = arith.addf %238, %237 : vector<16x1xf32>
    %cst_105 = arith.constant 1.000000e+00 : f32
    %240 = vector.broadcast %cst_105 : f32 to vector<16x1xf32>
    %241 = arith.mulf %240, %210 : vector<16x1xf32>
    %242 = vector.broadcast %213 : vector<1x1xf32> to vector<16x1xf32>
    %243 = arith.mulf %241, %242 : vector<16x1xf32>
    %244 = arith.addf %239, %243 : vector<16x1xf32>
    %cst_106 = arith.constant 1.000000e-15 : f32
    %245 = vector.broadcast %cst_106 : f32 to vector<16x1xf32>
    %246 = arith.maximumf %244, %245 : vector<16x1xf32>
    %cst_107 = arith.constant 1.000000e+00 : f32
    %247 = vector.broadcast %cst_107 : f32 to vector<16x1xf32>
    %248 = arith.divf %247, %246 : vector<16x1xf32>
    %249 = vector.broadcast %248 : vector<16x1xf32> to vector<16x128xf32>
    %250 = arith.mulf %235, %249 : vector<16x128xf32>
    %251 = arith.mulf %250, %250 : vector<16x128xf32>
    %cst_108 = arith.constant dense<0.000000e+00> : vector<16xf32>
    %252 = vector.multi_reduction <add>, %251, %cst_108 [1] : vector<16x128xf32> to vector<16xf32>
    %253 = vector.shape_cast %252 : vector<16xf32> to vector<16x1xf32>
    %cst_109 = arith.constant 1.000000e-30 : f32
    %254 = vector.broadcast %cst_109 : f32 to vector<16x1xf32>
    %255 = arith.maximumf %253, %254 : vector<16x1xf32>
    %256 = math.rsqrt %255 : vector<16x1xf32>
    %257 = arith.mulf %253, %256 : vector<16x1xf32>
    %cst_110 = arith.constant 0.995999991 : f32
    %258 = vector.broadcast %cst_110 : f32 to vector<16x1xf32>
    %259 = arith.cmpf ogt, %257, %258 : vector<16x1xf32>
    %cst_111 = arith.constant 0.995999991 : f32
    %260 = vector.broadcast %cst_111 : f32 to vector<16x1xf32>
    %261 = arith.mulf %256, %260 : vector<16x1xf32>
    %262 = vector.broadcast %261 : vector<16x1xf32> to vector<16x128xf32>
    %263 = arith.mulf %250, %262 : vector<16x128xf32>
    %264 = vector.shape_cast %259 : vector<16x1xi1> to vector<16x1xi1>
    %265 = vector.broadcast %264 : vector<16x1xi1> to vector<16x128xi1>
    %266 = arith.select %265, %263, %250 : vector<16x128xi1>, vector<16x128xf32>
    %c0_112 = arith.constant 0 : index
    %c0_113 = arith.constant 0 : index
    %267 = vector.load %arg15[%c0_112, %c0_113] : memref<16x128xf32, #tpu.memory_space<vmem>>, vector<16x128xf32>
    tpu.vector_store %arg15[%c0_112, %c0_113], %266 {strides = array<i32>} : memref<16x128xf32, #tpu.memory_space<vmem>>, vector<16x128xf32>,
    return
  }
}

</mosaic_0001>

<bundles_post_ra>
// kernel: forward.1
= control target key start
LH: loop header
LB: loop body
LE: loop exit
PB: predicated region body
PF: predicated region fallthrough
CT: control target
= control target key end

     0   :  { %20 = vsyncpa [#allocation3], 0  ;;  %s3338_s0 = inlined_call_operand.vmem [shape: f32[16,128], index: 0, kind: input, shape index: {}]   ;;  %s3339_s1 = inlined_call_operand.vmem [shape: f32[16,16], index: 1, kind: input, shape index: {}]   ;;  %s3340_s2 = inlined_call_operand.hbm [shape: f32[128,128], index: 2, kind: input, shape index: {}]   ;;  %s3341_s3 = inlined_call_operand.vmem [shape: f32[1,128], index: 3, kind: input, shape index: {}]   ;;  %s3342_s4 = inlined_call_operand.hbm [shape: f32[128,128], index: 4, kind: input, shape index: {}]   ;;  %s3343_s5 = inlined_call_operand.vmem [shape: f32[1,128], index: 5, kind: input, shape index: {}]   ;;  %s3344_s6 = inlined_call_operand.hbm [shape: f32[128,128], index: 6, kind: input, shape index: {}]   ;;  %s3345_s7 = inlined_call_operand.hbm [shape: f32[3,128,128], index: 7, kind: input, shape index: {}]   ;;  %s3346_s8 = inlined_call_operand.vmem [shape: f32[3,1,128], index: 8, kind: input, shape index: {}]   ;;  %s3347_s9 = inlined_call_operand.hbm [shape: f32[128,384], index: 9, kind: input, shape index: {}]   ;;  %s3348_s10 = inlined_call_operand.hbm [shape: f32[128,384], index: 10, kind: input, shape index: {}]   ;;  %s3349_s11 = inlined_call_operand.vmem [shape: f32[1,384], index: 11, kind: input, shape index: {}]   ;;  %s3350_s12 = inlined_call_operand.vmem [shape: f32[1,384], index: 12, kind: input, shape index: {}]   ;;  %s3351_s13 = inlined_call_operand.hbm [shape: f32[128,128], index: 13, kind: input, shape index: {}]   ;;  %s3352_s14 = inlined_call_operand.vmem [shape: f32[1,128], index: 14, kind: input, shape index: {}]   ;;  %s3353_s15 = inlined_call_operand.vmem [shape: f32[16,128], index: 15, kind: output, shape index: {}]  }
   0x1   :  { %21 = vsyncpa [#allocation5], 0 }
   0x2   :  { %22 = vsyncpa [#allocation8], 0 }
   0x3   :  { %23 = vsyncpa [#allocation11], 0  ;;  %s2912_s18 = smov [#allocation4]   ;;  %s2913_s20 = smov [#allocation7]  }
   0x4   :  { %s47_s19 = sshll.u32 %s2912_s18, 4  ;;  %s73_s21 = sshll.u32 %s2913_s20, 4  ;;  %s48_s19 = int_to_ptr.vmem [resolvable:$true] %s47_s19  ;;  %s3004_s21 = int_to_ptr.vmem [resolvable:$true] %s73_s21 }
   0x5   :  { %s2750_s24 = scalar_lea.hbm %s3342_s4, 2048 }
   0x6   :  { %p2751_p0 = scmp.ne.s32.totalorder %s3342_s4, %s2750_s24  ;;  %p2754_p1 = scmp.lt.u32.totalorder %s2750_s24, %s3342_s4 }
   0x8   :  { %p2756_p2 = pnand %p2754_p1, %p2751_p0 }
   0xa   :  { %2759 = shalt.err (!%p2756_p2)
}
   0xb   :  { %s2760_s29 = scalar_lea.vmem %s48_s19, 2048  ;;  %p2765_p4 = scmp.lt.s32.totalorder %s48_s19, %s48_s19 }
   0xc   :  { %p2761_p3 = scmp.ne.s32.totalorder %s48_s19, %s2760_s29  ;;  %p2766_p5 = scmp.lt.s32.totalorder %s2760_s29, %s2760_s29 }
   0xe   :  { %p2767_p6 = por %p2766_p5, %p2765_p4 }
  0x10   :  { %p2768_p7 = pnand %p2767_p6, %p2761_p3 }
  0x12   :  { %2771 = shalt.err (!%p2768_p7)
}
  0x13   :  { %s2914_s30 = smov 128   ;;  %s2915_s16 = smov 8  }
  0x14   :  { %53 = dma.hbm_to_vmem [thread:$0]  %s3342_s4, 2048, %s48_s19, [#allocation5], %s2914_s30, %s2914_s30, %s2915_s16  }
  0x15   :  { %s2772_s23 = scalar_lea.hbm %s3345_s7, 6144 }
  0x16   :  { %p2773_p8 = scmp.ne.s32.totalorder %s3345_s7, %s2772_s23  ;;  %p2776_p9 = scmp.lt.u32.totalorder %s2772_s23, %s3345_s7 }
  0x18   :  { %p2778_p10 = pnand %p2776_p9, %p2773_p8 }
  0x1a   :  { %2781 = shalt.err (!%p2778_p10)
}
  0x1b   :  { %s2782_s28 = scalar_lea.vmem %s3004_s21, 6144  ;;  %p2787_p12 = scmp.lt.s32.totalorder %s3004_s21, %s3004_s21 }
  0x1c   :  { %p2783_p11 = scmp.ne.s32.totalorder %s3004_s21, %s2782_s28  ;;  %p2788_p13 = scmp.lt.s32.totalorder %s2782_s28, %s2782_s28 }
  0x1e   :  { %p2789_p0 = por %p2788_p13, %p2787_p12 }
  0x20   :  { %p2790_p1 = pnand %p2789_p0, %p2783_p11 }
  0x22   :  { %2793 = shalt.err (!%p2790_p1)
}
  0x23   :  { %79 = dma.hbm_to_vmem [thread:$0]  %s3345_s7, 6144, %s3004_s21, [#allocation8], %s2914_s30, %s2914_s30, %s2915_s16  }
  0x24   :  { %s2916_s29 = smov [#allocation10]   ;;  %s2917_s18 = smov [#allocation2]  }
  0x25   :  { %s99_s17 = sshll.u32 %s2916_s29, 4  ;;  %s33_s20 = sshll.u32 %s2917_s18, 4  ;;  %s100_s17 = int_to_ptr.vmem [resolvable:$true] %s99_s17  ;;  %s3041_s20 = int_to_ptr.vmem [resolvable:$true] %s33_s20 }
  0x26   :  { %s2794_s24 = scalar_lea.hbm %s3348_s10, 6144 }
  0x27   :  { %p2795_p2 = scmp.ne.s32.totalorder %s3348_s10, %s2794_s24  ;;  %p2798_p3 = scmp.lt.u32.totalorder %s2794_s24, %s3348_s10 }
  0x29   :  { %p2800_p4 = pnand %p2798_p3, %p2795_p2 }
  0x2b   :  { %2803 = shalt.err (!%p2800_p4)
}
  0x2c   :  { %s2804_s7 = scalar_lea.vmem %s100_s17, 6144  ;;  %p2809_p6 = scmp.lt.s32.totalorder %s100_s17, %s100_s17 }
  0x2d   :  { %p2805_p5 = scmp.ne.s32.totalorder %s100_s17, %s2804_s7  ;;  %p2810_p7 = scmp.lt.s32.totalorder %s2804_s7, %s2804_s7 }
  0x2f   :  { %p2811_p8 = por %p2810_p7, %p2809_p6 }
  0x31   :  { %p2812_p9 = pnand %p2811_p8, %p2805_p5 }
  0x33   :  { %2815 = shalt.err (!%p2812_p9)
}
  0x34   :  { %s2918_s21 = smov 384   ;;  %s2919_s4 = smov 24  }
  0x35   :  { %105 = dma.hbm_to_vmem [thread:$0]  %s3348_s10, 6144, %s100_s17, [#allocation11], %s2918_s21, %s2918_s21, %s2919_s4  }
  0x36   :  { %s2816_s23 = scalar_lea.hbm %s3340_s2, 2048 }
  0x37   :  { %p2817_p10 = scmp.ne.s32.totalorder %s3340_s2, %s2816_s23  ;;  %p2820_p11 = scmp.lt.u32.totalorder %s2816_s23, %s3340_s2 }
  0x39   :  { %p2822_p12 = pnand %p2820_p11, %p2817_p10 }
  0x3b   :  { %2825 = shalt.err (!%p2822_p12)
}
  0x3c   :  { %s2826_s28 = scalar_lea.vmem %s3041_s20, 2048  ;;  %p2831_p0 = scmp.lt.s32.totalorder %s3041_s20, %s3041_s20 }
  0x3d   :  { %p2827_p13 = scmp.ne.s32.totalorder %s3041_s20, %s2826_s28  ;;  %p2832_p1 = scmp.lt.s32.totalorder %s2826_s28, %s2826_s28 }
  0x3f   :  { %p2833_p2 = por %p2832_p1, %p2831_p0 }
  0x41   :  { %p2834_p3 = pnand %p2833_p2, %p2827_p13 }
  0x43   :  { %2837 = shalt.err (!%p2834_p3)
}
  0x44   :  { %39 = dma.hbm_to_vmem [thread:$0]  %s3340_s2, 2048, %s3041_s20, [#allocation3], %s2914_s30, %s2914_s30, %s2915_s16  }
  0x45   :  { %s2920_s7 = smov [#allocation6]   ;;  %s2921_s29 = smov [#allocation9]  }
  0x46   :  { %s61_s19 = sshll.u32 %s2920_s7, 4  ;;  %s87_s18 = sshll.u32 %s2921_s29, 4  ;;  %s62_s19 = int_to_ptr.vmem [resolvable:$true] %s61_s19  ;;  %s3078_s18 = int_to_ptr.vmem [resolvable:$true] %s87_s18 }
  0x47   :  { %s2838_s24 = scalar_lea.hbm %s3344_s6, 2048 }
  0x48   :  { %p2839_p4 = scmp.ne.s32.totalorder %s3344_s6, %s2838_s24  ;;  %p2842_p5 = scmp.lt.u32.totalorder %s2838_s24, %s3344_s6 }
  0x4a   :  { %p2844_p6 = pnand %p2842_p5, %p2839_p4 }
  0x4c   :  { %2847 = shalt.err (!%p2844_p6)
}
  0x4d   :  { %s2848_s2 = scalar_lea.vmem %s62_s19, 2048  ;;  %p2853_p8 = scmp.lt.s32.totalorder %s62_s19, %s62_s19 }
  0x4e   :  { %p2849_p7 = scmp.ne.s32.totalorder %s62_s19, %s2848_s2  ;;  %p2854_p9 = scmp.lt.s32.totalorder %s2848_s2, %s2848_s2 }
  0x50   :  { %p2855_p10 = por %p2854_p9, %p2853_p8 }
  0x52   :  { %p2856_p11 = pnand %p2855_p10, %p2849_p7 }
  0x54   :  { %2859 = shalt.err (!%p2856_p11)
}
  0x55   :  { %67 = dma.hbm_to_vmem [thread:$0]  %s3344_s6, 2048, %s62_s19, [#allocation5], %s2914_s30, %s2914_s30, %s2915_s16  }
  0x56   :  { %s2860_s29 = scalar_lea.hbm %s3347_s9, 6144 }
  0x57   :  { %p2861_p12 = scmp.ne.s32.totalorder %s3347_s9, %s2860_s29  ;;  %p2864_p13 = scmp.lt.u32.totalorder %s2860_s29, %s3347_s9 }
  0x59   :  { %p2866_p0 = pnand %p2864_p13, %p2861_p12 }
  0x5b   :  { %2869 = shalt.err (!%p2866_p0)
}
  0x5c   :  { %s2870_s26 = scalar_lea.vmem %s3078_s18, 6144  ;;  %p2875_p2 = scmp.lt.s32.totalorder %s3078_s18, %s3078_s18 }
  0x5d   :  { %p2871_p1 = scmp.ne.s32.totalorder %s3078_s18, %s2870_s26  ;;  %p2876_p3 = scmp.lt.s32.totalorder %s2870_s26, %s2870_s26 }
  0x5f   :  { %p2877_p4 = por %p2876_p3, %p2875_p2 }
  0x61   :  { %p2878_p5 = pnand %p2877_p4, %p2871_p1 }
  0x63   :  { %2881 = shalt.err (!%p2878_p5)
}
  0x64   :  { %93 = dma.hbm_to_vmem [thread:$0]  %s3347_s9, 6144, %s3078_s18, [#allocation8], %s2918_s21, %s2918_s21, %s2919_s4  }
  0x65   :  { %s2922_s27 = smov [#allocation12]   ;;  %s2882_s10 = scalar_lea.hbm %s3351_s13, 2048 }
  0x66   :  { %s115_s28 = sshll.u32 %s2922_s27, 4  ;;  %p2883_p6 = scmp.ne.s32.totalorder %s3351_s13, %s2882_s10  ;;  %s116_s28 = int_to_ptr.vmem [resolvable:$true] %s115_s28 }
  0x67   :  { %p2886_p7 = scmp.lt.u32.totalorder %s2882_s10, %s3351_s13 }
  0x69   :  { %p2888_p8 = pnand %p2886_p7, %p2883_p6 }
  0x6b   :  { %2891 = shalt.err (!%p2888_p8)
}
  0x6c   :  { %s2892_s23 = scalar_lea.vmem %s116_s28, 2048  ;;  %p2897_p10 = scmp.lt.s32.totalorder %s116_s28, %s116_s28 }
  0x6d   :  { %p2893_p9 = scmp.ne.s32.totalorder %s116_s28, %s2892_s23  ;;  %p2898_p11 = scmp.lt.s32.totalorder %s2892_s23, %s2892_s23 }
  0x6f   :  { %p2899_p12 = por %p2898_p11, %p2897_p10 }
  0x71   :  { %p2900_p13 = pnand %p2899_p12, %p2893_p9 }
  0x73   :  { %2903 = shalt.err (!%p2900_p13)
}
  0x74   :  { %121 = dma.hbm_to_vmem [thread:$0]  %s3351_s13, 2048, %s116_s28, [#allocation11], %s2914_s30, %s2914_s30, %s2915_s16  }
  0x75   :  { %2904 = dma.done.wait [#allocation3], 2048  }
  0x76   :  { %2905 = vsyncadd [#allocation3], 4294965248 }
  0x77   :  { %2906 = dma.done.wait [#allocation5], 4096  }
  0x78   :  { %2907 = vsyncadd [#allocation5], 4294963200 }
  0x79   :  { %2908 = dma.done.wait [#allocation8], 12288  }
  0x7a   :  { %2909 = vsyncadd [#allocation8], 4294955008 }
  0x7b   :  { %2910 = dma.done.wait [#allocation11], 8192  }
  0x7c   :  { %2911 = vsyncadd [#allocation11], 4294959104  ;;  %v149_v0 = vld [vmem:[#allocation2] sm:$0xff]  ;;  %v150_v1 = vld [vmem:[#allocation2 + $0x8] sm:$0xff]  ;;  %vm247_vm0 = vcmask 130048   ;;  %vm1733_vm3 = vcmask 1040384  }
  0x7d   :  { %v151_v2 = vld [vmem:[#allocation2 + $0x10] sm:$0xff]  ;;  %v2326_v3 = vpack.c.bf16 %v150_v1, %v149_v0  ;;  %v152_v4 = vld [vmem:[#allocation2 + $0x18] sm:$0xff]  ;;  %v153_v6 = vld [vmem:[#allocation2 + $0x20] sm:$0xff] }
  0x7e   :  { %v2330_v5 = vpack.c.bf16 %v152_v4, %v151_v2  ;;  %v154_v7 = vld [vmem:[#allocation2 + $0x28] sm:$0xff]  ;;  %v147_v9 = vld [vmem:[%s3338_s0] sm:$0xff]  ;;  %v155_v10 = vld [vmem:[#allocation2 + $0x30] sm:$0xff] }
  0x7f   :  { %2327 = vmatprep.subr.bf16.mxu0 %v2326_v3  ;;  %v2334_v8 = vpack.c.bf16 %v154_v7, %v153_v6  ;;  %v156_v11 = vld [vmem:[#allocation2 + $0x38] sm:$0xff]  ;;  %2034 = vmatprep.mubr.f32.mxu0 %v147_v9  ;;  %v157_v13 = vld [vmem:[#allocation2 + $0x40] sm:$0xff]  ;;  %v158_v14 = vld [vmem:[#allocation2 + $0x48] sm:$0xff] }
  0x80   :  { %2329 = vmatpush3.bf16.msra.mxu0 %v2326_v3  ;;  %v2338_v12 = vpack.c.bf16 %v156_v11, %v155_v10  ;;  %v2342_v15 = vpack.c.bf16 %v158_v14, %v157_v13  ;;  %v159_v16 = vld [vmem:[#allocation2 + $0x50] sm:$0xff]  ;;  %v160_v17 = vld [vmem:[#allocation2 + $0x58] sm:$0xff]  ;;  %v161_v19 = vld [vmem:[#allocation2 + $0x60] sm:$0xff] }
  0x81   :  { %2331 = vmatprep.subr.bf16.mxu0 %v2330_v5  ;;  %v2346_v18 = vpack.c.bf16 %v160_v17, %v159_v16  ;;  %v162_v20 = vld [vmem:[#allocation2 + $0x68] sm:$0xff]  ;;  %v163_v22 = vld [vmem:[#allocation2 + $0x70] sm:$0xff]  ;;  %v164_v23 = vld [vmem:[#allocation2 + $0x78] sm:$0xff] }
  0x82   :  { %v2350_v21 = vpack.c.bf16 %v162_v20, %v161_v19  ;;  %v2354_v24 = vpack.c.bf16 %v164_v23, %v163_v22  ;;  %v148_v25 = vld [vmem:[%s3338_s0 + $0x8] sm:$0xff]  ;;  %v145_v26 = vld [vmem:[%s3339_s1] sm:$0xff]  ;;  %v349_v33 = vld [vmem:[#allocation4 + $0x10] sm:$0xff] }
  0x83   :  { %2041 = vmatprep.mubr.msk.f32.mxu1 %vm247_vm0, %v145_v26  ;;  %v3144_v30 = vld [vmem:[%s3339_s1 + $0x8] sm:$0xff]  ;;  %v347_v31 = vld [vmem:[#allocation4] sm:$0xff]  ;;  %v350_v35 = vld [vmem:[#allocation4 + $0x18] sm:$0xff] }
  0x84   :  { %2333 = vmatpush3.bf16.msra.mxu0 %v2330_v5  ;;  %v348_v32 = vld [vmem:[#allocation4 + $0x8] sm:$0xff]  ;;  %v2366_v36 = vpack.c.bf16 %v350_v35, %v349_v33  ;;  %v351_v37 = vld [vmem:[#allocation4 + $0x20] sm:$0xff]  ;;  %v353_v49 = vld [vmem:[#allocation4 + $0x30] sm:$0xff] }
  0x85   :  { %2335 = vmatprep.subr.bf16.mxu0 %v2334_v8  ;;  %v2362_v34 = vpack.c.bf16 %v348_v32, %v347_v31  ;;  %v352_v38 = vld [vmem:[#allocation4 + $0x28] sm:$0xff]  ;;  %v1813_v40 = vld [vmem:[%s3341_s3] ss:$0 sm:$0xff]  ;;  %v354_v50 = vld [vmem:[#allocation4 + $0x38] sm:$0xff] }
  0x86   :  { %v2370_v39 = vpack.c.bf16 %v352_v38, %v351_v37  ;;  %v2374_v51 = vpack.c.bf16 %v354_v50, %v353_v49  ;;  %v355_v52 = vld [vmem:[#allocation4 + $0x40] sm:$0xff]  ;;  %v356_v53 = vld [vmem:[#allocation4 + $0x48] sm:$0xff]  ;;  %v357_v55 = vld [vmem:[#allocation4 + $0x50] sm:$0xff] }
  0x87   :  { %v2378_v54 = vpack.c.bf16 %v356_v53, %v355_v52  ;;  %v358_v56 = vld [vmem:[#allocation4 + $0x58] sm:$0xff]  ;;  %v359_v58 = vld [vmem:[#allocation4 + $0x60] sm:$0xff]  ;;  %v360_v59 = vld [vmem:[#allocation4 + $0x68] sm:$0xff] }
  0x88   :  { %2337 = vmatpush3.bf16.msra.mxu0 %v2334_v8  ;;  %v2382_v57 = vpack.c.bf16 %v358_v56, %v357_v55  ;;  %v2386_v60 = vpack.c.bf16 %v360_v59, %v359_v58  ;;  %v361_v61 = vld [vmem:[#allocation4 + $0x70] sm:$0xff]  ;;  %v362_v62 = vld [vmem:[#allocation4 + $0x78] sm:$0xff]  ;;  %v538_v0 = vld [vmem:[#allocation6] sm:$0xff] }
  0x89   :  { %2339 = vmatprep.subr.bf16.mxu0 %v2338_v12  ;;  %v2390_v63 = vpack.c.bf16 %v362_v62, %v361_v61  ;;  %554 = vrot.lane.b32.xlu1 %v538_v0, %s2915_s16  ;;  %v540_v1 = vld [vmem:[#allocation6 + $0x10] sm:$0xff]  ;;  %v539_v2 = vld [vmem:[#allocation6 + $0x8] sm:$0xff]  ;;  %v3154_v3 = vld [vmem:[#allocation6 + $0x18] sm:$0xff] }
  0x8a   :  { %v3158_v4 = vld [vmem:[#allocation6 + $0x20] sm:$0xff]  ;;  %v3162_v5 = vld [vmem:[#allocation6 + $0x28] sm:$0xff]  ;;  %v3170_v19 = vld [vmem:[#allocation6 + $0x38] sm:$0xff] }
  0x8b   :  { %v3174_v20 = vld [vmem:[#allocation6 + $0x40] sm:$0xff]  ;;  %v3182_v22 = vld [vmem:[#allocation6 + $0x50] sm:$0xff]  ;;  %v3184_v23 = vld [vmem:[#allocation6 + $0x58] sm:$0xff] }
  0x8c   :  { %2341 = vmatpush3.bf16.msra.mxu0 %v2338_v12  ;;  %v598_v33 = vld [vmem:[#allocation7 + $0x10] sm:$0xff]  ;;  %v600_v38 = vld [vmem:[#allocation7 + $0x20] sm:$0xff]  ;;  %v607_v50 = vld [vmem:[#allocation7 + $0x58] sm:$0xff] }
  0x8d   :  { %2343 = vmatprep.subr.bf16.mxu0 %v2342_v15  ;;  %556 = vrot.lane.b32.xlu1 %v539_v2, %s2915_s16  ;;  %v606_v49 = vld [vmem:[#allocation7 + $0x50] sm:$0xff]  ;;  %v609_v52 = vld [vmem:[#allocation7 + $0x68] sm:$0xff]  ;;  %v611_v56 = vld [vmem:[#allocation7 + $0x78] sm:$0xff] }
  0x8e   :  { %v610_v55 = vld [vmem:[#allocation7 + $0x70] sm:$0xff] }
  0x90   :  { %2345 = vmatpush3.bf16.msra.mxu0 %v2342_v15 }
  0x91   :  { %2347 = vmatprep.subr.bf16.mxu0 %v2346_v18  ;;  %560 = vrot.lane.b32.xlu1 %v3154_v3, %s2915_s16 }
  0x94   :  { %2349 = vmatpush3.bf16.msra.mxu0 %v2346_v18  ;;  %v3166_v18 = vld [vmem:[#allocation6 + $0x30] sm:$0xff] }
  0x95   :  { %2351 = vmatprep.subr.bf16.mxu0 %v2350_v21  ;;  %562 = vrot.lane.b32.xlu1 %v3158_v4, %s2915_s16 }
  0x98   :  { %2353 = vmatpush3.bf16.msra.mxu0 %v2350_v21  ;;  %v3176_v21 = vld [vmem:[#allocation6 + $0x48] sm:$0xff] }
  0x99   :  { %2355 = vmatprep.subr.bf16.mxu0 %v2354_v24  ;;  %564 = vrot.lane.b32.xlu1 %v3162_v5, %s2915_s16 }
  0x9c   :  { %2357 = vmatpush3.bf16.msra.mxu0 %v2354_v24  ;;  %v3190_v24 = vld [vmem:[#allocation6 + $0x60] sm:$0xff] }
  0x9d   :  { %566 = vrot.lane.b32.xlu1 %v3166_v18, %s2915_s16 }
  0x9f   :  { %2035 = vmatmul.mubr.f32.vlgmr.msra.gmra.mrb[0].mxu0 %v148_v25  ;;  %v3192_v25 = vld [vmem:[#allocation6 + $0x68] sm:$0xff] }
  0xa0   :  { %2083 = vmatprep.mubr.msk.f32.mxu0 %vm247_vm0, %v145_v26  ;;  %v596_v26 = vld [vmem:[#allocation7] sm:$0xff] }
  0xa1   :  { %568 = vrot.lane.b32.xlu1 %v3170_v19, %s2915_s16 }
  0xa5   :  { %570 = vrot.lane.b32.xlu1 %v3174_v20, %s2915_s16 }
  0xa9   :  { %574 = vrot.lane.b32.xlu1 %v3182_v22, %s2915_s16 }
  0xad   :  { %578 = vrot.lane.b32.xlu1 %v3190_v24, %s2915_s16 }
  0xfb   :  { %v555_v35 = vpop.permute.xlu1 %554 }
 0x172   :  { %v2036_v27 = vpop.f32.mrb[0].mxu0 }
 0x173   :  { %v231_v28 = vpop.f32.mrb[1].mxu0 }
 0x174   :  { %v2358_v29 = vpack.c.bf16 %v2036_v27, %v231_v28  ;;  %v597_v27 = vld [vmem:[#allocation7 + $0x8] sm:$0xff] }
 0x175   :  { %v2398_v32 = vpack.c.bf16 %v597_v27, %v596_v26  ;;  %v804_v27 = vld [vmem:[#allocation7 + $0xa8] sm:$0xff] }
 0x176   :  { %2359 = vmatprep.subr.bf16.mxu1 %v2358_v29 }
 0x177   :  { %2361 = vmatpush3.bf16.msra.mxu1 %v2358_v29 }
 0x178   :  { %2363 = vmatprep.subr.bf16.mxu1 %v2362_v34 }
 0x17a   :  { %2042 = vmatmul.mubr.msk.f32.vlgmr.msra.gmra.mrb[0].mxu1 %vm247_vm0, %v3144_v30 }
 0x17b   :  { %2365 = vmatpush3.bf16.msra.mxu1 %v2362_v34  ;;  %v599_v34 = vld [vmem:[#allocation7 + $0x18] sm:$0xff] }
 0x17c   :  { %2367 = vmatprep.subr.bf16.mxu1 %v2366_v36  ;;  %v2402_v37 = vpack.c.bf16 %v599_v34, %v598_v33  ;;  %v808_v33 = vld [vmem:[#allocation7 + $0xc8] sm:$0xff] }
 0x17f   :  { %2369 = vmatpush3.bf16.msra.mxu1 %v2366_v36  ;;  %v582_v36 = vadd.f32 %v555_v35, %v540_v1  ;;  %v809_v35 = vld [vmem:[#allocation7 + $0xd0] sm:$0xff] }
 0x180   :  { %2371 = vmatprep.subr.bf16.mxu1 %v2370_v39 }
 0x183   :  { %2373 = vmatpush3.bf16.msra.mxu1 %v2370_v39  ;;  %v601_v39 = vld [vmem:[#allocation7 + $0x28] sm:$0xff] }
 0x184   :  { %2375 = vmatprep.subr.bf16.mxu1 %v2374_v51 }
 0x187   :  { %2377 = vmatpush3.bf16.msra.mxu1 %v2374_v51  ;;  %v608_v51 = vld [vmem:[#allocation7 + $0x60] sm:$0xff] }
 0x188   :  { %2379 = vmatprep.subr.bf16.mxu1 %v2378_v54 }
 0x18b   :  { %2381 = vmatpush3.bf16.msra.mxu1 %v2378_v54  ;;  %v2422_v54 = vpack.c.bf16 %v609_v52, %v608_v51 }
 0x18c   :  { %2383 = vmatprep.subr.bf16.mxu1 %v2382_v57 }
 0x18f   :  { %2385 = vmatpush3.bf16.msra.mxu1 %v2382_v57  ;;  %v2426_v57 = vpack.c.bf16 %v611_v56, %v610_v55 }
 0x190   :  { %2387 = vmatprep.subr.bf16.mxu1 %v2386_v60 }
 0x193   :  { %2389 = vmatpush3.bf16.msra.mxu1 %v2386_v60 }
 0x194   :  { %2391 = vmatprep.subr.bf16.mxu1 %v2390_v63 }
 0x197   :  { %2393 = vmatpush3.bf16.msra.mxu1 %v2390_v63 }
 0x24d   :  { %v2043_v41 = vpop.f32.mrb[0].mxu1 }
 0x24e   :  { %v320_v42 = vpop.f32.mrb[1].mxu1  ;;  %v326_v43 = vadd.f32 %v2043_v41, %v1813_v40  ;;  %v602_v41 = vld [vmem:[#allocation7 + $0x30] sm:$0xff] }
 0x24f   :  { %v321_v44 = vadd.f32 %v1813_v40, %v320_v42  ;;  %v2406_v40 = vpack.c.bf16 %v601_v39, %v600_v38  ;;  %v603_v42 = vld [vmem:[#allocation7 + $0x38] sm:$0xff]  ;;  %v811_v38 = vld [vmem:[#allocation7 + $0xe0] sm:$0xff]  ;;  %v812_v39 = vld [vmem:[#allocation7 + $0xe8] sm:$0xff] }
 0x250   :  { %v330_v46 = vmax.f32 %v326_v43, 0.0  ;;  %v557_v43 = vpop.permute.xlu1 %556 }
 0x251   :  { %v329_v45 = vmax.f32 %v321_v44, 0.0  ;;  %v2410_v44 = vpack.c.bf16 %v603_v42, %v602_v41  ;;  %v583_v61 = vadd.f32 %v557_v43, %v3154_v3  ;;  %v813_v43 = vld [vmem:[#allocation7 + $0xf0] sm:$0xff] }
 0x252   :  { %v332_v48 = vmul.f32 %v330_v46, %v330_v46 }
 0x253   :  { %v331_v47 = vmul.f32 %v329_v45, %v329_v45 }
 0x255   :  { %333 = vadd.xlane.f32.xlu0 %v331_v47 }
 0x259   :  { %335 = vadd.xlane.f32.xlu0 %v332_v48  ;;  %v561_v48 = vpop.permute.xlu1 %560 }
 0x25a   :  { %v585_v63 = vadd.f32 %v561_v48, %v3162_v5 }
 0x25d   :  { %v563_v53 = vpop.permute.xlu1 %562 }
 0x261   :  { %v565_v58 = vpop.permute.xlu1 %564 }
 0x262   :  { %v587_v2 = vadd.f32 %v565_v58, %v3170_v19  ;;  %v799_v19 = vld [vmem:[#allocation7 + $0x80] sm:$0xff] }
 0x265   :  { %v567_v60 = vpop.permute.xlu1 %566 }
 0x269   :  { %v569_v0 = vpop.permute.xlu1 %568 }
 0x26a   :  { %v589_v3 = vadd.f32 %v569_v0, %v3176_v21 }
 0x26f   :  { %558 = vrot.lane.b32.xlu0 %v540_v1, %s2915_s16  ;;  %v586_v1 = vadd.f32 %v563_v53, %v3166_v18 }
 0x273   :  { %572 = vrot.lane.b32.xlu0 %v3176_v21, %s2915_s16  ;;  %v801_v21 = vld [vmem:[#allocation7 + $0x90] sm:$0xff] }
 0x277   :  { %576 = vrot.lane.b32.xlu0 %v3184_v23, %s2915_s16 }
 0x27b   :  { %580 = vrot.lane.b32.xlu0 %v3192_v25, %s2915_s16 }
 0x2e2   :  { %v334_v6 = vpop.xlane.xlu0 %333 }
 0x2e3   :  { %v337_v7 = vmax.f32 %v334_v6, 1e-30  ;;  %v588_v6 = vadd.f32 %v567_v60, %v3174_v20  ;;  %v800_v20 = vld [vmem:[#allocation7 + $0x88] sm:$0xff] }
 0x2e5   :  { %2678 = vrsqrt.f32 %v337_v7  ;;  %v571_v7 = vpop.permute.xlu1 %570 }
 0x2e6   :  { %v336_v8 = vpop.xlane.xlu0 %335 }
 0x2e7   :  { %v338_v9 = vmax.f32 %v336_v8, 1e-30 }
 0x2e9   :  { %2680 = vrsqrt.f32 %v338_v9  ;;  %v575_v9 = vpop.permute.xlu1 %574 }
 0x2ea   :  { %v559_v59 = vpop.permute.xlu0 %558 }
 0x2eb   :  { %v584_v62 = vadd.f32 %v559_v59, %v3158_v4  ;;  %v590_v4 = vadd.f32 %v571_v7, %v3182_v22  ;;  %v2430_v22 = vpack.c.bf16 %v800_v20, %v799_v19 }
 0x2ed   :  { %2431 = vmatprep.subr.bf16.mxu1 %v2430_v22 }
 0x2ee   :  { %v573_v8 = vpop.permute.xlu0 %572 }
 0x2ef   :  { %v2679_v10 = vpop.eup %2678  ;;  %v591_v5 = vadd.f32 %v573_v8, %v3184_v23  ;;  %v802_v23 = vld [vmem:[#allocation7 + $0x98] sm:$0xff] }
 0x2f0   :  { %v341_v11 = vmul.f32 3.106303, %v2679_v10  ;;  %v592_v10 = vadd.f32 %v575_v9, %v3190_v24  ;;  %v2434_v26 = vpack.c.bf16 %v802_v23, %v801_v21  ;;  %v803_v24 = vld [vmem:[#allocation7 + $0xa0] sm:$0xff] }
 0x2f2   :  { %v343_v12 = vmin.f32 %v341_v11, 1.0  ;;  %v577_v11 = vpop.permute.xlu0 %576 }
 0x2f3   :  { %v2681_v13 = vpop.eup %2680 }
 0x2f4   :  { %v342_v14 = vmul.f32 3.106303, %v2681_v13  ;;  %v345_v15 = vmul.f32 %v343_v12, %v329_v45  ;;  %v604_v45 = vld [vmem:[#allocation7 + $0x40] sm:$0xff]  ;;  %v593_v12 = vadd.f32 %v577_v11, %v3192_v25  ;;  %v552_v13 = vld [vmem:[#allocation6 + $0x70] sm:$0xff]  ;;  %v2438_v25 = vpack.c.bf16 %v804_v27, %v803_v24 }
 0x2f6   :  { %v344_v16 = vmin.f32 %v342_v14, 1.0  ;;  %2076 = vmatprep.mubr.f32.mxu1 %v345_v15  ;;  %v579_v14 = vpop.permute.xlu1 %578 }
 0x2f7   :  { %v594_v15 = vadd.f32 %v579_v14, %v552_v13 }
 0x2f8   :  { %v346_v17 = vmul.f32 %v344_v16, %v330_v46  ;;  %v605_v46 = vld [vmem:[#allocation7 + $0x48] sm:$0xff]  ;;  %v553_v16 = vld [vmem:[#allocation6 + $0x78] sm:$0xff] }
 0x2f9   :  { %v2414_v47 = vpack.c.bf16 %v605_v46, %v604_v45  ;;  %v3218_v46 = vld [vmem:[%s3346_s8] ss:$0 sm:$0xff] }
 0x2fa   :  { %2077 = vmatmul.mubr.f32.vlgmr.msra.gmra.mrb[2].mxu1 %v346_v17  ;;  %v581_v17 = vpop.permute.xlu0 %580 }
 0x2fb   :  { %v595_v18 = vadd.f32 %v581_v17, %v553_v16  ;;  %2433 = vmatpush3.bf16.msra.mxu1 %v2430_v22 }
 0x2fc   :  { %2435 = vmatprep.subr.bf16.mxu1 %v2434_v26 }
 0x2ff   :  { %2437 = vmatpush3.bf16.msra.mxu1 %v2434_v26 }
 0x300   :  { %2439 = vmatprep.subr.bf16.mxu1 %v2438_v25 }
 0x303   :  { %2441 = vmatpush3.bf16.msra.mxu1 %v2438_v25 }
 0x3cd   :  { %v2078_v28 = vpop.f32.mrb[2].mxu1 }
 0x3ce   :  { %v429_v29 = vpop.f32.mrb[3].mxu1 }
 0x3cf   :  { %v2394_v31 = vpack.c.bf16 %v2078_v28, %v429_v29  ;;  %v805_v28 = vld [vmem:[#allocation7 + $0xb0] sm:$0xff]  ;;  %v806_v29 = vld [vmem:[#allocation7 + $0xb8] sm:$0xff] }
 0x3d1   :  { %2395 = vmatprep.subr.bf16.mxu0 %v2394_v31 }
 0x3d2   :  { %2397 = vmatpush3.bf16.msra.mxu0 %v2394_v31  ;;  %v2442_v31 = vpack.c.bf16 %v806_v29, %v805_v28 }
 0x3d3   :  { %2399 = vmatprep.subr.bf16.mxu0 %v2398_v32 }
 0x3d4   :  { %2443 = vmatprep.subr.bf16.mxu1 %v2442_v31 }
 0x3d5   :  { %2084 = vmatmul.mubr.msk.f32.vlgmr.msra.gmra.mrb[2].mxu0 %vm247_vm0, %v3144_v30  ;;  %v2418_v30 = vpack.c.bf16 %v607_v50, %v606_v49  ;;  %2445 = vmatpush3.bf16.msra.mxu1 %v2442_v31 }
 0x3d6   :  { %2401 = vmatpush3.bf16.msra.mxu0 %v2398_v32  ;;  %2118 = vmatprep.mubr.f32.mxu0 %v582_v36  ;;  %v807_v32 = vld [vmem:[#allocation7 + $0xc0] sm:$0xff]  ;;  %v810_v36 = vld [vmem:[#allocation7 + $0xd8] sm:$0xff] }
 0x3d7   :  { %2403 = vmatprep.subr.bf16.mxu0 %v2402_v37  ;;  %v2446_v34 = vpack.c.bf16 %v808_v33, %v807_v32 }
 0x3d9   :  { %2447 = vmatprep.subr.bf16.mxu1 %v2446_v34 }
 0x3da   :  { %2405 = vmatpush3.bf16.msra.mxu0 %v2402_v37  ;;  %v2450_v37 = vpack.c.bf16 %v810_v36, %v809_v35  ;;  %2449 = vmatpush3.bf16.msra.mxu1 %v2446_v34 }
 0x3db   :  { %2407 = vmatprep.subr.bf16.mxu0 %v2406_v40 }
 0x3dc   :  { %2451 = vmatprep.subr.bf16.mxu1 %v2450_v37 }
 0x3de   :  { %2409 = vmatpush3.bf16.msra.mxu0 %v2406_v40  ;;  %v2454_v40 = vpack.c.bf16 %v812_v39, %v811_v38  ;;  %2453 = vmatpush3.bf16.msra.mxu1 %v2450_v37 }
 0x3df   :  { %2411 = vmatprep.subr.bf16.mxu0 %v2410_v44 }
 0x3e0   :  { %2455 = vmatprep.subr.bf16.mxu1 %v2454_v40 }
 0x3e2   :  { %2413 = vmatpush3.bf16.msra.mxu0 %v2410_v44  ;;  %2457 = vmatpush3.bf16.msra.mxu1 %v2454_v40  ;;  %v814_v44 = vld [vmem:[#allocation7 + $0xf8] sm:$0xff] }
 0x3e3   :  { %2415 = vmatprep.subr.bf16.mxu0 %v2414_v47  ;;  %v2458_v45 = vpack.c.bf16 %v814_v44, %v813_v43 }
 0x3e5   :  { %2459 = vmatprep.subr.bf16.mxu1 %v2458_v45 }
 0x3e6   :  { %2417 = vmatpush3.bf16.msra.mxu0 %v2414_v47  ;;  %2461 = vmatpush3.bf16.msra.mxu1 %v2458_v45 }
 0x3e7   :  { %2419 = vmatprep.subr.bf16.mxu0 %v2418_v30 }
 0x3ea   :  { %2421 = vmatpush3.bf16.msra.mxu0 %v2418_v30 }
 0x3eb   :  { %2423 = vmatprep.subr.bf16.mxu0 %v2422_v54 }
 0x3ee   :  { %2425 = vmatpush3.bf16.msra.mxu0 %v2422_v54 }
 0x3ef   :  { %2427 = vmatprep.subr.bf16.mxu0 %v2426_v57 }
 0x3f2   :  { %2429 = vmatpush3.bf16.msra.mxu0 %v2426_v57 }
 0x3f5   :  { %2119 = vmatmul.mubr.f32.vlgmr.msra.gmra.mrb[4].mxu0 %v583_v61 }
 0x3f6   :  { %2121 = vmatprep.mubr.f32.mxu0 %v584_v62 }
 0x3f9   :  { %2122 = vmatmul.mubr.f32.gmra.mrb[6].mxu0 %v585_v63 }
 0x3fa   :  { %2124 = vmatprep.mubr.f32.mxu0 %v586_v1 }
 0x3fd   :  { %2125 = vmatmul.mubr.f32.gmra.mrb[8].mxu0 %v587_v2 }
 0x3fe   :  { %2127 = vmatprep.mubr.f32.mxu0 %v588_v6 }
 0x401   :  { %2128 = vmatmul.mubr.f32.gmra.mrb[10].mxu0 %v589_v3 }
 0x402   :  { %2130 = vmatprep.mubr.f32.mxu0 %v590_v4 }
 0x405   :  { %2131 = vmatmul.mubr.f32.gmra.mrb[12].mxu0 %v591_v5 }
 0x406   :  { %2133 = vmatprep.mubr.f32.mxu0 %v592_v10 }
 0x409   :  { %2134 = vmatmul.mubr.f32.gmra.mrb[14].mxu0 %v593_v12 }
 0x40a   :  { %2136 = vmatprep.mubr.f32.mxu0 %v594_v15 }
 0x40d   :  { %2137 = vmatmul.mubr.f32.gmra.mrb[16].mxu0 %v595_v18 }
 0x4a8   :  { %v3211_v41 = vpop.f32.mrb[2].mxu0 }
 0x4a9   :  { %v3213_v42 = vpop.f32.mrb[3].mxu0 }
 0x4c8   :  { %v2120_v47 = vpop.f32.mrb[4].mxu0 }
 0x4c9   :  { %v691_v48 = vadd.f32 %v2120_v47, %v3218_v46  ;;  %v685_v49 = vpop.f32.mrb[5].mxu0 }
 0x4ca   :  { %v686_v50 = vadd.f32 %v3218_v46, %v685_v49  ;;  %v944_v49 = vld [vmem:[#allocation7 + $0x108] sm:$0xff] }
 0x4cb   :  { %v755_v30 = vmax.f32 %v691_v48, 0.0  ;;  %v943_v48 = vld [vmem:[#allocation7 + $0x100] sm:$0xff] }
 0x4cc   :  { %v754_v51 = vmax.f32 %v686_v50, 0.0  ;;  %v2123_v52 = vpop.f32.mrb[6].mxu0  ;;  %v2462_v50 = vpack.c.bf16 %v944_v49, %v943_v48  ;;  %v1071_v49 = vld [vmem:[#allocation9 + $0x68] sm:$0xff] }
 0x4cd   :  { %v701_v53 = vadd.f32 %v2123_v52, %v3218_v46  ;;  %770 = vrot.lane.b32.xlu0 %v755_v30, %s2915_s16  ;;  %v695_v54 = vpop.f32.mrb[7].mxu0  ;;  %v946_v30 = vld [vmem:[#allocation7 + $0x118] sm:$0xff]  ;;  %v947_v52 = vld [vmem:[#allocation7 + $0x120] sm:$0xff] }
 0x4ce   :  { %v696_v55 = vadd.f32 %v3218_v46, %v695_v54  ;;  %768 = vrot.lane.b32.xlu1 %v754_v51, %s2915_s16  ;;  %2463 = vmatprep.subr.bf16.mxu0 %v2462_v50 }
 0x4cf   :  { %v757_v56 = vmax.f32 %v701_v53, 0.0  ;;  %v948_v53 = vld [vmem:[#allocation7 + $0x128] sm:$0xff]  ;;  %2465 = vmatpush3.bf16.msra.mxu0 %v2462_v50 }
 0x4d0   :  { %v756_v57 = vmax.f32 %v696_v55, 0.0  ;;  %v2126_v58 = vpop.f32.mrb[8].mxu0  ;;  %v2470_v54 = vpack.c.bf16 %v948_v53, %v947_v52  ;;  %v949_v55 = vld [vmem:[#allocation7 + $0x130] sm:$0xff]  ;;  %v1077_v52 = vld [vmem:[#allocation9 + $0x98] sm:$0xff] }
 0x4d1   :  { %v711_v59 = vadd.f32 %v2126_v58, %v3218_v46  ;;  %774 = vrot.lane.b32.xlu0 %v757_v56, %s2915_s16  ;;  %v705_v60 = vpop.f32.mrb[9].mxu0  ;;  %v950_v56 = vld [vmem:[#allocation7 + $0x138] sm:$0xff]  ;;  %v951_v58 = vld [vmem:[#allocation7 + $0x140] sm:$0xff] }
 0x4d2   :  { %v706_v61 = vadd.f32 %v3218_v46, %v705_v60  ;;  %772 = vrot.lane.b32.xlu1 %v756_v57, %s2915_s16  ;;  %v2474_v57 = vpack.c.bf16 %v950_v56, %v949_v55  ;;  %v1079_v55 = vld [vmem:[#allocation9 + $0xa8] sm:$0xff] }
 0x4d3   :  { %v759_v62 = vmax.f32 %v711_v59, 0.0  ;;  %v952_v59 = vld [vmem:[#allocation7 + $0x148] sm:$0xff] }
 0x4d4   :  { %v758_v63 = vmax.f32 %v706_v61, 0.0  ;;  %v2129_v0 = vpop.f32.mrb[10].mxu0  ;;  %v2478_v60 = vpack.c.bf16 %v952_v59, %v951_v58  ;;  %v953_v61 = vld [vmem:[#allocation7 + $0x150] sm:$0xff]  ;;  %v1086_v58 = vld [vmem:[#allocation9 + $0xe0] sm:$0xff] }
 0x4d5   :  { %778 = vrot.lane.b32.xlu0 %v759_v62, %s2915_s16  ;;  %v721_v1 = vadd.f32 %v2129_v0, %v3218_v46  ;;  %v715_v2 = vpop.f32.mrb[11].mxu0  ;;  %v955_v0 = vld [vmem:[#allocation7 + $0x160] sm:$0xff] }
 0x4d6   :  { %776 = vrot.lane.b32.xlu1 %v758_v63, %s2915_s16  ;;  %v716_v6 = vadd.f32 %v3218_v46, %v715_v2 }
 0x4d7   :  { %v761_v7 = vmax.f32 %v721_v1, 0.0  ;;  %v956_v1 = vld [vmem:[#allocation7 + $0x168] sm:$0xff] }
 0x4d8   :  { %v760_v3 = vmax.f32 %v716_v6, 0.0  ;;  %v2132_v4 = vpop.f32.mrb[12].mxu0  ;;  %v2486_v2 = vpack.c.bf16 %v956_v1, %v955_v0  ;;  %v957_v6 = vld [vmem:[#allocation7 + $0x170] sm:$0xff] }
 0x4d9   :  { %v731_v8 = vadd.f32 %v2132_v4, %v3218_v46  ;;  %v725_v5 = vpop.f32.mrb[13].mxu0  ;;  %782 = vrot.lane.b32.xlu0 %v761_v7, %s2915_s16  ;;  %v1821_v4 = vld [vmem:[%s3346_s8 + $0x1] ss:$0 sm:$0xff]  ;;  %v1092_v0 = vld [vmem:[#allocation9 + $0x110] sm:$0xff] }
 0x4da   :  { %780 = vrot.lane.b32.xlu1 %v760_v3, %s2915_s16  ;;  %v726_v9 = vadd.f32 %v3218_v46, %v725_v5  ;;  %v1062_v5 = vld [vmem:[#allocation9 + $0x20] sm:$0xff] }
 0x4db   :  { %v763_v10 = vmax.f32 %v731_v8, 0.0  ;;  %v1059_v8 = vld [vmem:[#allocation9 + $0x8] sm:$0xff] }
 0x4dc   :  { %v762_v11 = vmax.f32 %v726_v9, 0.0  ;;  %v2135_v12 = vpop.f32.mrb[14].mxu0  ;;  %v1058_v9 = vld [vmem:[#allocation9] sm:$0xff] }
 0x4dd   :  { %786 = vrot.lane.b32.xlu0 %v763_v10, %s2915_s16  ;;  %v735_v13 = vpop.f32.mrb[15].mxu0  ;;  %v741_v22 = vadd.f32 %v2135_v12, %v3218_v46  ;;  %v1060_v12 = vld [vmem:[#allocation9 + $0x10] sm:$0xff] }
 0x4de   :  { %784 = vrot.lane.b32.xlu1 %v762_v11, %s2915_s16  ;;  %v736_v26 = vadd.f32 %v3218_v46, %v735_v13  ;;  %v1063_v13 = vld [vmem:[#allocation9 + $0x28] sm:$0xff] }
 0x4df   :  { %v765_v28 = vmax.f32 %v741_v22, 0.0 }
 0x4e0   :  { %v2138_v14 = vpop.f32.mrb[16].mxu0  ;;  %v764_v32 = vmax.f32 %v736_v26, 0.0 }
 0x4e1   :  { %v745_v15 = vpop.f32.mrb[17].mxu0  ;;  %v751_v29 = vadd.f32 %v2138_v14, %v3218_v46 }
 0x4e2   :  { %v746_v33 = vadd.f32 %v3218_v46, %v745_v15  ;;  %v945_v46 = vld [vmem:[#allocation7 + $0x110] sm:$0xff]  ;;  %v3247_v15 = vpack.c.bf16 %v1063_v13, %v1060_v12 }
 0x4e3   :  { %v767_v37 = vmax.f32 %v751_v29, 0.0  ;;  %v2466_v51 = vpack.c.bf16 %v946_v30, %v945_v46  ;;  %v1074_v46 = vld [vmem:[#allocation9 + $0x80] sm:$0xff]  ;;  %v1104_v12 = vld [vmem:[#allocation9 + $0x170] sm:$0xff] }
 0x4e4   :  { %v766_v40 = vmax.f32 %v746_v33, 0.0  ;;  %v2502_v50 = vpack.c.bf16 %v1074_v46, %v1071_v49  ;;  %v1070_v30 = vld [vmem:[#allocation9 + $0x60] sm:$0xff]  ;;  %v1105_v49 = vld [vmem:[#allocation9 + $0x178] sm:$0xff] }
 0x4e5   :  { %2467 = vmatprep.subr.bf16.mxu0 %v2466_v51 }
 0x4e6   :  { %2469 = vmatpush3.bf16.msra.mxu0 %v2466_v51  ;;  %v1073_v51 = vld [vmem:[#allocation9 + $0x78] sm:$0xff] }
 0x4e7   :  { %2471 = vmatprep.subr.bf16.mxu0 %v2470_v54 }
 0x4ea   :  { %2473 = vmatpush3.bf16.msra.mxu0 %v2470_v54  ;;  %v1076_v54 = vld [vmem:[#allocation9 + $0x90] sm:$0xff] }
 0x4eb   :  { %2475 = vmatprep.subr.bf16.mxu0 %v2474_v57  ;;  %v2508_v56 = vpack.c.bf16 %v1079_v55, %v1076_v54 }
 0x4ee   :  { %2477 = vmatpush3.bf16.msra.mxu0 %v2474_v57  ;;  %v1083_v57 = vld [vmem:[#allocation9 + $0xc8] sm:$0xff] }
 0x4ef   :  { %2479 = vmatprep.subr.bf16.mxu0 %v2478_v60  ;;  %v2510_v59 = vpack.c.bf16 %v1086_v58, %v1083_v57 }
 0x4f2   :  { %2481 = vmatpush3.bf16.msra.mxu0 %v2478_v60  ;;  %v1082_v60 = vld [vmem:[#allocation9 + $0xc0] sm:$0xff] }
 0x53f   :  { %v771_v16 = vpop.permute.xlu0 %770 }
 0x540   :  { %v769_v17 = vpop.permute.xlu1 %768  ;;  %v789_v19 = vadd.f32 %v771_v16, %v759_v62  ;;  %v954_v62 = vld [vmem:[#allocation7 + $0x158] sm:$0xff] }
 0x541   :  { %v788_v18 = vadd.f32 %v769_v17, %v758_v63  ;;  %v2482_v63 = vpack.c.bf16 %v954_v62, %v953_v61  ;;  %v1065_v16 = vld [vmem:[#allocation9 + $0x38] sm:$0xff]  ;;  %v1068_v17 = vld [vmem:[#allocation9 + $0x50] sm:$0xff] }
 0x542   :  { %v1085_v61 = vld [vmem:[#allocation9 + $0xd8] sm:$0xff] }
 0x543   :  { %2171 = vmatprep.mubr.f32.mxu1 %v788_v18  ;;  %v775_v20 = vpop.permute.xlu0 %774  ;;  %2483 = vmatprep.subr.bf16.mxu0 %v2482_v63  ;;  %v1064_v18 = vld [vmem:[#allocation9 + $0x30] sm:$0xff]  ;;  %v2512_v62 = vpack.c.bf16 %v1085_v61, %v1082_v60  ;;  %v1279_v60 = vld [vmem:[#allocation10 + $0x20] sm:$0xff] }
 0x544   :  { %v773_v21 = vpop.permute.xlu1 %772  ;;  %2172 = vmatmul.mubr.f32.vlgmr.msra.gmra.mrb[4].mxu1 %v789_v19  ;;  %v791_v24 = vadd.f32 %v775_v20, %v761_v7  ;;  %2485 = vmatpush3.bf16.msra.mxu0 %v2482_v63  ;;  %v958_v7 = vld [vmem:[#allocation7 + $0x178] sm:$0xff]  ;;  %v2498_v19 = vpack.c.bf16 %v1068_v17, %v1065_v16  ;;  %v1067_v20 = vld [vmem:[#allocation9 + $0x48] sm:$0xff]  ;;  %v1275_v61 = vld [vmem:[#allocation10] sm:$0xff] }
 0x545   :  { %v790_v23 = vadd.f32 %v773_v21, %v760_v3  ;;  %2487 = vmatprep.subr.bf16.mxu0 %v2486_v2  ;;  %v2490_v3 = vpack.c.bf16 %v958_v7, %v957_v6  ;;  %v2500_v22 = vpack.c.bf16 %v1067_v20, %v1064_v18  ;;  %v1089_v63 = vld [vmem:[#allocation9 + $0xf8] sm:$0xff]  ;;  %v1091_v6 = vld [vmem:[#allocation9 + $0x108] sm:$0xff]  ;;  %v2923_v18 = vmov 0.0  }
 0x546   :  { %v2514_v1 = vpack.c.bf16 %v1092_v0, %v1089_v63  ;;  %v1103_v16 = vld [vmem:[#allocation9 + $0x168] sm:$0xff]  ;;  %v1278_v63 = vld [vmem:[#allocation10 + $0x18] sm:$0xff]  ;;  %v1277_v0 = vld [vmem:[#allocation10 + $0x10] sm:$0xff] }
 0x547   :  { %2174 = vmatprep.mubr.f32.mxu1 %v790_v23  ;;  %v779_v27 = vpop.permute.xlu0 %778 }
 0x548   :  { %v777_v25 = vpop.permute.xlu1 %776  ;;  %2175 = vmatmul.mubr.f32.gmra.mrb[6].mxu1 %v791_v24  ;;  %v793_v34 = vadd.f32 %v779_v27, %v763_v10  ;;  %2489 = vmatpush3.bf16.msra.mxu0 %v2486_v2  ;;  %v2494_v10 = vpack.c.bf16 %v1062_v5, %v1059_v8  ;;  %v1088_v2 = vld [vmem:[#allocation9 + $0xf0] sm:$0xff]  ;;  %v1094_v5 = vld [vmem:[#allocation9 + $0x120] sm:$0xff] }
 0x549   :  { %v792_v31 = vadd.f32 %v777_v25, %v762_v11  ;;  %2491 = vmatprep.subr.bf16.mxu0 %v2490_v3  ;;  %v1061_v11 = vld [vmem:[#allocation9 + $0x18] sm:$0xff]  ;;  %v2516_v7 = vpack.c.bf16 %v1091_v6, %v1088_v2  ;;  %v2560_v2 = vpack.c.bf16 %v1278_v63, %v1275_v61 }
 0x54a   :  { %v2496_v14 = vpack.c.bf16 %v1061_v11, %v1058_v9  ;;  %2495 = vmatprep.subr.bf16.mxu1 %v2494_v10  ;;  %v1097_v9 = vld [vmem:[#allocation9 + $0x138] sm:$0xff] }
 0x54b   :  { %2177 = vmatprep.mubr.f32.mxu1 %v792_v31  ;;  %v783_v35 = vpop.permute.xlu0 %782  ;;  %v2520_v10 = vpack.c.bf16 %v1097_v9, %v1094_v5  ;;  %v1101_v11 = vld [vmem:[#allocation9 + $0x158] sm:$0xff] }
 0x54c   :  { %2178 = vmatmul.mubr.f32.gmra.mrb[8].mxu1 %v793_v34  ;;  %v781_v36 = vpop.permute.xlu1 %780  ;;  %v795_v38 = vadd.f32 %v783_v35, %v765_v28  ;;  %2493 = vmatpush3.bf16.msra.mxu0 %v2490_v3  ;;  %v1095_v3 = vld [vmem:[#allocation9 + $0x128] sm:$0xff]  ;;  %v2522_v13 = vpack.c.bf16 %v1104_v12, %v1101_v11  ;;  %v1286_v5 = vld [vmem:[#allocation10 + $0x58] sm:$0xff]  ;;  %v1291_v12 = vld [vmem:[#allocation10 + $0x80] sm:$0xff] }
 0x54d   :  { %v794_v39 = vadd.f32 %v781_v36, %v764_v32  ;;  %2497 = vmatpush1.bf16.msra.mxu1 %v2496_v14  ;;  %2527 = vmatprep.subr.bf16.mxu0 %v3247_v15  ;;  %v1100_v14 = vld [vmem:[#allocation9 + $0x150] sm:$0xff]  ;;  %v1288_v11 = vld [vmem:[#allocation10 + $0x68] sm:$0xff]  ;;  %v1314_v61 = vld [vmem:[#allocation10 + $0x138] sm:$0xff] }
 0x54e   :  { %2499 = vmatprep.subr.bf16.mxu1 %v2498_v19  ;;  %v2524_v17 = vpack.c.bf16 %v1103_v16, %v1100_v14  ;;  %v2566_v14 = vpack.c.bf16 %v1291_v12, %v1288_v11  ;;  %v1290_v16 = vld [vmem:[#allocation10 + $0x78] sm:$0xff] }
 0x54f   :  { %2180 = vmatprep.mubr.f32.mxu1 %v794_v39  ;;  %v787_v43 = vpop.permute.xlu0 %786  ;;  %v1816_v39 = vld [vmem:[%s3343_s5] ss:$0 sm:$0xff] }
 0x550   :  { %2181 = vmatmul.mubr.f32.gmra.mrb[10].mxu1 %v795_v38  ;;  %v785_v44 = vpop.permute.xlu1 %784  ;;  %v797_v45 = vadd.f32 %v787_v43, %v767_v37 }
 0x551   :  { %v796_v47 = vadd.f32 %v785_v44, %v766_v40  ;;  %2501 = vmatpush1.bf16.msra.mxu1 %v2500_v22  ;;  %v517_v40 = vadd.f32 %v3211_v41, %v1816_v39  ;;  %v512_v44 = vadd.f32 %v1816_v39, %v3213_v42  ;;  %v2504_v41 = vpack.c.bf16 %v1073_v51, %v1070_v30  ;;  %v1080_v42 = vld [vmem:[#allocation9 + $0xb0] sm:$0xff]  ;;  %v1069_v22 = vld [vmem:[#allocation9 + $0x58] sm:$0xff] }
 0x552   :  { %2503 = vmatprep.subr.bf16.mxu1 %v2502_v50  ;;  %v2506_v53 = vpack.c.bf16 %v1080_v42, %v1077_v52  ;;  %v1093_v39 = vld [vmem:[#allocation9 + $0x118] sm:$0xff] }
 0x553   :  { %2183 = vmatprep.mubr.f32.mxu1 %v796_v47  ;;  %v3260_v43 = vmax.f32 %v517_v40, 0.0  ;;  %v3265_v47 = vmax.f32 %v512_v44, 0.0  ;;  %v1096_v44 = vld [vmem:[#allocation9 + $0x130] sm:$0xff] }
 0x554   :  { %2184 = vmatmul.mubr.f32.gmra.mrb[12].mxu1 %v797_v45 }
 0x555   :  { %v523_v45 = vmul.f32 %v3260_v43, %v3260_v43  ;;  %v522_v48 = vmul.f32 %v3265_v47, %v3265_v47  ;;  %2505 = vmatpush1.bf16.msra.mxu1 %v2504_v41  ;;  %1187 = vmatprep.mubr.f32.mxu1 %v2923_v18 }
 0x556   :  { %2507 = vmatprep.subr.bf16.mxu1 %v2506_v53 }
 0x559   :  { %2509 = vmatpush1.bf16.msra.mxu1 %v2508_v56 }
 0x55a   :  { %2511 = vmatprep.subr.bf16.mxu1 %v2510_v59  ;;  %v1276_v59 = vld [vmem:[#allocation10 + $0x8] sm:$0xff] }
 0x55d   :  { %2513 = vmatpush1.bf16.msra.mxu1 %v2512_v62  ;;  %v2558_v62 = vpack.c.bf16 %v1279_v60, %v1276_v59  ;;  %v1311_v60 = vld [vmem:[#allocation10 + $0x120] sm:$0xff] }
 0x55e   :  { %2515 = vmatprep.subr.bf16.mxu1 %v2514_v1  ;;  %v1280_v1 = vld [vmem:[#allocation10 + $0x28] sm:$0xff]  ;;  %v2584_v63 = vpack.c.bf16 %v1314_v61, %v1311_v60 }
 0x55f   :  { %v2590_v6 = vpack.c.bf16 %v1280_v1, %v1277_v0  ;;  %v1316_v0 = vld [vmem:[#allocation10 + $0x148] sm:$0xff] }
 0x561   :  { %2517 = vmatpush1.bf16.msra.mxu1 %v2516_v7  ;;  %v1285_v7 = vld [vmem:[#allocation10 + $0x50] sm:$0xff] }
 0x617   :  { %v2173_v21 = vpop.f32.mrb[4].mxu1 }
 0x618   :  { %v895_v23 = vadd.f32 %v2173_v21, %v1821_v4  ;;  %v889_v26 = vpop.f32.mrb[5].mxu1  ;;  %v1066_v21 = vld [vmem:[#allocation9 + $0x40] sm:$0xff] }
 0x619   :  { %v890_v24 = vadd.f32 %v1821_v4, %v889_v26 }
 0x61a   :  { %v933_v27 = vmax.f32 %v895_v23, 0.0 }
 0x61b   :  { %v932_v25 = vmax.f32 %v890_v24, 0.0  ;;  %v2176_v28 = vpop.f32.mrb[6].mxu1 }
 0x61c   :  { %938 = vrot.lane.b32.xlu0 %v933_v27, %s2915_s16  ;;  %v899_v29 = vpop.f32.mrb[7].mxu1  ;;  %v1072_v28 = vld [vmem:[#allocation9 + $0x70] sm:$0xff] }
 0x61d   :  { %936 = vrot.lane.b32.xlu1 %v932_v25, %s2915_s16  ;;  %v2530_v25 = vpack.c.bf16 %v1069_v22, %v1066_v21  ;;  %v1075_v29 = vld [vmem:[#allocation9 + $0x88] sm:$0xff]  ;;  %v1823_v22 = vld [vmem:[%s3346_s8 + $0x2] ss:$0 sm:$0xff] }
 0x61f   :  { %v2179_v31 = vpop.f32.mrb[8].mxu1 }
 0x620   :  { %v907_v32 = vpop.f32.mrb[9].mxu1  ;;  %v2534_v31 = vpack.c.bf16 %v1075_v29, %v1072_v28  ;;  %v1294_v29 = vld [vmem:[#allocation10 + $0x98] sm:$0xff] }
 0x621   :  { %v1078_v32 = vld [vmem:[#allocation9 + $0xa0] sm:$0xff] }
 0x623   :  { %v2182_v33 = vpop.f32.mrb[10].mxu1 }
 0x624   :  { %v915_v34 = vpop.f32.mrb[11].mxu1  ;;  %v1081_v33 = vld [vmem:[#allocation9 + $0xb8] sm:$0xff] }
 0x625   :  { %v2538_v34 = vpack.c.bf16 %v1081_v33, %v1078_v32  ;;  %v1293_v33 = vld [vmem:[#allocation10 + $0x90] sm:$0xff] }
 0x627   :  { %v2185_v35 = vpop.f32.mrb[12].mxu1 }
 0x628   :  { %v3252_v36 = vadd.f32 %v2185_v35, %v1821_v4  ;;  %v923_v37 = vpop.f32.mrb[13].mxu1  ;;  %v1084_v35 = vld [vmem:[#allocation9 + $0xd0] sm:$0xff] }
 0x629   :  { %v3254_v38 = vadd.f32 %v1821_v4, %v923_v37  ;;  %v1098_v4 = vld [vmem:[#allocation9 + $0x140] sm:$0xff]  ;;  %v1087_v37 = vld [vmem:[#allocation9 + $0xe8] sm:$0xff] }
 0x62a   :  { %v2518_v8 = vpack.c.bf16 %v1098_v4, %v1095_v3  ;;  %v935_v23 = vmax.f32 %v3252_v36, 0.0  ;;  %v2542_v36 = vpack.c.bf16 %v1087_v37, %v1084_v35  ;;  %v1284_v4 = vld [vmem:[#allocation10 + $0x48] sm:$0xff]  ;;  %v1295_v35 = vld [vmem:[#allocation10 + $0xa0] sm:$0xff] }
 0x62b   :  { %v934_v19 = vmax.f32 %v3254_v38, 0.0  ;;  %v1090_v38 = vld [vmem:[#allocation9 + $0x100] sm:$0xff] }
 0x62c   :  { %2519 = vmatprep.subr.bf16.mxu1 %v2518_v8  ;;  %v2546_v40 = vpack.c.bf16 %v1093_v39, %v1090_v38  ;;  %v1283_v8 = vld [vmem:[#allocation10 + $0x40] sm:$0xff]  ;;  %v1300_v39 = vld [vmem:[#allocation10 + $0xc8] sm:$0xff] }
 0x62d   :  { %2521 = vmatpush1.bf16.msra.mxu1 %v2520_v10  ;;  %v2594_v10 = vpack.c.bf16 %v1286_v5, %v1283_v8  ;;  %v1322_v8 = vld [vmem:[#allocation10 + $0x178] sm:$0xff] }
 0x62e   :  { %2523 = vmatprep.subr.bf16.mxu1 %v2522_v13  ;;  %v1287_v13 = vld [vmem:[#allocation10 + $0x60] sm:$0xff] }
 0x62f   :  { %v2568_v21 = vpack.c.bf16 %v1290_v16, %v1287_v13 }
 0x631   :  { %2525 = vmatpush1.bf16.msra.mxu1 %v2524_v17  ;;  %v1289_v17 = vld [vmem:[#allocation10 + $0x70] sm:$0xff] }
 0x632   :  { %2559 = vmatprep.subr.bf16.mxu1 %v2558_v62  ;;  %v1313_v62 = vld [vmem:[#allocation10 + $0x130] sm:$0xff] }
 0x633   :  { %v2614_v1 = vpack.c.bf16 %v1316_v0, %v1313_v62 }
 0x63b   :  { %526 = vadd.xlane.f32.xlu0 %v523_v45  ;;  %v1099_v45 = vld [vmem:[#allocation9 + $0x148] sm:$0xff] }
 0x641   :  { %524 = vadd.xlane.f32.xlu1 %v522_v48  ;;  %v1102_v48 = vld [vmem:[#allocation9 + $0x160] sm:$0xff] }
 0x642   :  { %v2554_v46 = vpack.c.bf16 %v1105_v49, %v1102_v48  ;;  %v1301_v48 = vld [vmem:[#allocation10 + $0xd0] sm:$0xff] }
 0x68e   :  { %v939_v20 = vpop.permute.xlu0 %938 }
 0x68f   :  { %v937_v26 = vpop.permute.xlu1 %936  ;;  %v941_v27 = vadd.f32 %v939_v20, %v935_v23 }
 0x690   :  { %v940_v24 = vadd.f32 %v937_v26, %v934_v19  ;;  %v1292_v19 = vld [vmem:[#allocation10 + $0x88] sm:$0xff] }
 0x691   :  { %v2598_v20 = vpack.c.bf16 %v1292_v19, %v1289_v17 }
 0x692   :  { %2218 = vmatprep.mubr.f32.mxu0 %v940_v24 }
 0x693   :  { %2219 = vmatmul.mubr.f32.vlgmr.msra.gmra.mrb[18].mxu0 %v941_v27 }
 0x694   :  { %2529 = vmatpush3.bf16.msra.mxu0 %v3247_v15  ;;  %v2550_v15 = vpack.c.bf16 %v1099_v45, %v1096_v44  ;;  %v1299_v45 = vld [vmem:[#allocation10 + $0xc0] sm:$0xff] }
 0x695   :  { %2531 = vmatprep.subr.bf16.mxu0 %v2530_v25 }
 0x698   :  { %2533 = vmatpush3.bf16.msra.mxu0 %v2530_v25 }
 0x699   :  { %2535 = vmatprep.subr.bf16.mxu0 %v2534_v31 }
 0x69c   :  { %2537 = vmatpush3.bf16.msra.mxu0 %v2534_v31  ;;  %v1297_v31 = vld [vmem:[#allocation10 + $0xb0] sm:$0xff] }
 0x69d   :  { %2539 = vmatprep.subr.bf16.mxu0 %v2538_v34  ;;  %v2570_v32 = vpack.c.bf16 %v1297_v31, %v1294_v29 }
 0x6a0   :  { %2541 = vmatpush3.bf16.msra.mxu0 %v2538_v34  ;;  %v1296_v34 = vld [vmem:[#allocation10 + $0xa8] sm:$0xff] }
 0x6a1   :  { %2543 = vmatprep.subr.bf16.mxu0 %v2542_v36  ;;  %v2572_v37 = vpack.c.bf16 %v1296_v34, %v1293_v33 }
 0x6a4   :  { %2545 = vmatpush3.bf16.msra.mxu0 %v2542_v36  ;;  %v1298_v36 = vld [vmem:[#allocation10 + $0xb8] sm:$0xff] }
 0x6a5   :  { %2547 = vmatprep.subr.bf16.mxu0 %v2546_v40  ;;  %v2602_v38 = vpack.c.bf16 %v1298_v36, %v1295_v35 }
 0x6a8   :  { %2549 = vmatpush3.bf16.msra.mxu0 %v2546_v40  ;;  %v1303_v40 = vld [vmem:[#allocation10 + $0xe0] sm:$0xff] }
 0x6a9   :  { %2551 = vmatprep.subr.bf16.mxu0 %v2550_v15  ;;  %v2574_v44 = vpack.c.bf16 %v1303_v40, %v1300_v39 }
 0x6ac   :  { %2553 = vmatpush3.bf16.msra.mxu0 %v2550_v15  ;;  %v1302_v15 = vld [vmem:[#allocation10 + $0xd8] sm:$0xff] }
 0x6ad   :  { %2555 = vmatprep.subr.bf16.mxu0 %v2554_v46  ;;  %v2576_v49 = vpack.c.bf16 %v1302_v15, %v1299_v45 }
 0x6b0   :  { %2557 = vmatpush3.bf16.msra.mxu0 %v2554_v46  ;;  %v1304_v46 = vld [vmem:[#allocation10 + $0xe8] sm:$0xff] }
 0x6b1   :  { %2591 = vmatprep.subr.bf16.mxu0 %v2590_v6 }
 0x6c8   :  { %v527_v50 = vpop.xlane.xlu0 %526 }
 0x6c9   :  { %v529_v30 = vmax.f32 %v527_v50, 1e-30  ;;  %v2606_v50 = vpack.c.bf16 %v1304_v46, %v1301_v48 }
 0x6cb   :  { %2682 = vrsqrt.f32 %v529_v30  ;;  %v1306_v30 = vld [vmem:[#allocation10 + $0xf8] sm:$0xff] }
 0x6ce   :  { %v525_v51 = vpop.xlane.xlu1 %524 }
 0x6cf   :  { %v528_v41 = vmax.f32 %v525_v51, 1e-30  ;;  %v1309_v51 = vld [vmem:[#allocation10 + $0x110] sm:$0xff] }
 0x6d1   :  { %2684 = vrsqrt.f32 %v528_v41  ;;  %v2578_v41 = vpack.c.bf16 %v1309_v51, %v1306_v30 }
 0x6d5   :  { %v2683_v52 = vpop.eup %2682 }
 0x6d6   :  { %v533_v42 = vmul.f32 3.106303, %v2683_v52  ;;  %v1305_v52 = vld [vmem:[#allocation10 + $0xf0] sm:$0xff] }
 0x6d8   :  { %v535_v55 = vmin.f32 %v533_v42, 1.0  ;;  %v1308_v42 = vld [vmem:[#allocation10 + $0x108] sm:$0xff] }
 0x6da   :  { %v537_v58 = vmul.f32 %v535_v55, %v3260_v43  ;;  %v1281_v43 = vld [vmem:[#allocation10 + $0x30] sm:$0xff]  ;;  %v1310_v55 = vld [vmem:[#allocation10 + $0x118] sm:$0xff] }
 0x6db   :  { %v2685_v53 = vpop.eup %2684  ;;  %v2564_v9 = vpack.c.bf16 %v1284_v4, %v1281_v43  ;;  %v1320_v43 = vld [vmem:[#allocation10 + $0x168] sm:$0xff] }
 0x6dc   :  { %v532_v54 = vmul.f32 3.106303, %v2685_v53  ;;  %v1307_v53 = vld [vmem:[#allocation10 + $0x100] sm:$0xff] }
 0x6de   :  { %v534_v56 = vmin.f32 %v532_v54, 1.0  ;;  %v2580_v54 = vpack.c.bf16 %v1308_v42, %v1305_v52 }
 0x6e0   :  { %v536_v57 = vmul.f32 %v534_v56, %v3265_v47  ;;  %v1282_v47 = vld [vmem:[#allocation10 + $0x38] sm:$0xff]  ;;  %v2610_v56 = vpack.c.bf16 %v1310_v55, %v1307_v53 }
 0x6e1   :  { %v2562_v3 = vpack.c.bf16 %v1285_v7, %v1282_v47  ;;  %v1317_v7 = vld [vmem:[#allocation10 + $0x150] sm:$0xff] }
 0x6e2   :  { %1188 = vmatmul.mubr.f32.vlgmr.msra.gmra.mrb[14].mxu1 %v536_v57  ;;  %2253 = vmatprep.mubr.f32.mxu0 %v536_v57  ;;  %v1312_v57 = vld [vmem:[#allocation10 + $0x128] sm:$0xff]  ;;  %v2588_v4 = vpack.c.bf16 %v1320_v43, %v1317_v7 }
 0x6e3   :  { %2254 = vmatmul.mubr.f32.vlgmr.msra.gmra.mrb[20].mxu0 %v537_v58  ;;  %1193 = vmatprep.mubr.f32.mxu1 %v2923_v18 }
 0x6e4   :  { %2561 = vmatpush1.bf16.msra.mxu1 %v2560_v2  ;;  %2593 = vmatpush3.bf16.msra.mxu0 %v2590_v6  ;;  %v1318_v2 = vld [vmem:[#allocation10 + $0x158] sm:$0xff]  ;;  %v1321_v6 = vld [vmem:[#allocation10 + $0x170] sm:$0xff] }
 0x6e5   :  { %2563 = vmatprep.subr.bf16.mxu1 %v2562_v3  ;;  %2595 = vmatprep.subr.bf16.mxu0 %v2594_v10  ;;  %v2586_v47 = vpack.c.bf16 %v1321_v6, %v1318_v2  ;;  %v1319_v3 = vld [vmem:[#allocation10 + $0x160] sm:$0xff] }
 0x6e6   :  { %1194 = vmatmul.mubr.f32.gmra.mrb[16].mxu1 %v537_v58  ;;  %v1315_v58 = vld [vmem:[#allocation10 + $0x140] sm:$0xff]  ;;  %v2618_v5 = vpack.c.bf16 %v1322_v8, %v1319_v3 }
 0x6e7   :  { %1404 = vmatprep.mubr.f32.mxu1 %v2923_v18  ;;  %v2582_v59 = vpack.c.bf16 %v1315_v58, %v1312_v57 }
 0x6e8   :  { %2565 = vmatpush1.bf16.msra.mxu1 %v2564_v9  ;;  %2597 = vmatpush3.bf16.msra.mxu0 %v2594_v10 }
 0x6e9   :  { %2567 = vmatprep.subr.bf16.mxu1 %v2566_v14  ;;  %2599 = vmatprep.subr.bf16.mxu0 %v2598_v20 }
 0x6ec   :  { %2569 = vmatpush1.bf16.msra.mxu1 %v2568_v21  ;;  %2601 = vmatpush3.bf16.msra.mxu0 %v2598_v20 }
 0x6ed   :  { %2571 = vmatprep.subr.bf16.mxu1 %v2570_v32  ;;  %2603 = vmatprep.subr.bf16.mxu0 %v2602_v38 }
 0x6f0   :  { %2573 = vmatpush1.bf16.msra.mxu1 %v2572_v37  ;;  %2605 = vmatpush3.bf16.msra.mxu0 %v2602_v38 }
 0x6f1   :  { %2575 = vmatprep.subr.bf16.mxu1 %v2574_v44  ;;  %2607 = vmatprep.subr.bf16.mxu0 %v2606_v50 }
 0x6f4   :  { %2577 = vmatpush1.bf16.msra.mxu1 %v2576_v49  ;;  %2609 = vmatpush3.bf16.msra.mxu0 %v2606_v50 }
 0x6f5   :  { %2579 = vmatprep.subr.bf16.mxu1 %v2578_v41  ;;  %2611 = vmatprep.subr.bf16.mxu0 %v2610_v56 }
 0x6f8   :  { %2581 = vmatpush1.bf16.msra.mxu1 %v2580_v54  ;;  %2613 = vmatpush3.bf16.msra.mxu0 %v2610_v56 }
 0x6f9   :  { %2583 = vmatprep.subr.bf16.mxu1 %v2582_v59  ;;  %2615 = vmatprep.subr.bf16.mxu0 %v2614_v1 }
 0x6fc   :  { %2585 = vmatpush1.bf16.msra.mxu1 %v2584_v63  ;;  %2617 = vmatpush3.bf16.msra.mxu0 %v2614_v1 }
 0x6fd   :  { %2587 = vmatprep.subr.bf16.mxu1 %v2586_v47  ;;  %2619 = vmatprep.subr.bf16.mxu0 %v2618_v5 }
 0x700   :  { %2589 = vmatpush1.bf16.msra.mxu1 %v2588_v4  ;;  %2621 = vmatpush3.bf16.msra.mxu0 %v2618_v5 }
 0x766   :  { %v2220_v23 = vpop.f32.mrb[18].mxu0 }
 0x767   :  { %v3280_v26 = vadd.f32 %v2220_v23, %v1823_v22  ;;  %v1033_v24 = vpop.f32.mrb[19].mxu0 }
 0x768   :  { %v3282_v27 = vadd.f32 %v1823_v22, %v1033_v24 }
 0x769   :  { %v1043_v25 = vmul.f32 %v3280_v26, %v3280_v26 }
 0x76a   :  { %v1042_v28 = vmul.f32 %v3282_v27, %v3282_v27 }
 0x76b   :  { %1046 = vadd.xlane.f32.xlu1 %v1043_v25  ;;  %v1108_v25 = vlaneseq }
 0x76c   :  { %1044 = vadd.xlane.f32.xlu0 %v1042_v28 }
 0x76d   :  { %v1109_v28 = vshrl.u32 %v1108_v25, 7  ;;  %v1559_v25 = vld [vmem:[#allocation12 + $0x8] sm:$0xff] }
 0x76f   :  { %v3303_v29 = vsub.s32 0, %v1109_v28  ;;  %v1114_v31 = vsub.s32 1, %v1109_v28  ;;  %v1118_v55 = vsub.s32 2, %v1109_v28  ;;  %v1560_v28 = vld [vmem:[#allocation12 + $0x10] sm:$0xff] }
 0x7b6   :  { %v3288_v9 = vpop.f32.mrb[20].mxu0 }
 0x7b7   :  { %v3290_v10 = vpop.f32.mrb[21].mxu0 }
 0x7f8   :  { %v1047_v11 = vpop.xlane.xlu1 %1046 }
 0x7f9   :  { %v1049_v12 = vmax.f32 %v1047_v11, 1e-30  ;;  %v1045_v13 = vpop.xlane.xlu0 %1044 }
 0x7fa   :  { %v1048_v14 = vmax.f32 %v1045_v13, 1e-30 }
 0x7fb   :  { %2686 = vrsqrt.f32 %v1049_v12 }
 0x7fc   :  { %2688 = vrsqrt.f32 %v1048_v14 }
 0x805   :  { %v2687_v16 = vpop.eup %2686 }
 0x806   :  { %v2689_v17 = vpop.eup %2688  ;;  %v1053_v19 = vmul.f32 3.106303, %v2687_v16 }
 0x807   :  { %v1052_v20 = vmul.f32 3.106303, %v2689_v17 }
 0x808   :  { %v1055_v21 = vmin.f32 %v1053_v19, 1.0 }
 0x809   :  { %v1054_v22 = vmin.f32 %v1052_v20, 1.0 }
 0x80a   :  { %v3296_v24 = vmul.f32 %v1055_v21, %v3280_v26  ;;  %v1106_v26 = vld [vmem:[%s3349_s11] sm:$0x7] }
 0x80b   :  { %v3293_v23 = vmul.f32 %v1054_v22, %v3282_v27  ;;  %v1323_v27 = vld [vmem:[%s3350_s12] sm:$0x7]  ;;  %v1111_v32 = vrot.slane %v1106_v26, %v3303_v29  ;;  %v1119_v59 = vrot.slane %v1106_v26, %v1118_v55 }
 0x80c   :  { %v1328_v33 = vrot.slane %v1323_v27, %v3303_v29  ;;  %v1332_v34 = vrot.slane %v1323_v27, %v1114_v31  ;;  %v1336_v57 = vrot.slane %v1323_v27, %v1118_v55  ;;  %v1558_v22 = vld [vmem:[#allocation12] sm:$0xff]  ;;  %v1561_v27 = vld [vmem:[#allocation12 + $0x18] sm:$0xff] }
 0x80d   :  { %1405 = vmatmul.mubr.f32.vlgmr.msra.gmra.mrb[14].mxu1 %v3293_v23  ;;  %2288 = vmatprep.mubr.f32.mxu0 %v3293_v23  ;;  %v1267_v0 = vadd.f32 %v3290_v10, %v1119_v59  ;;  %v1272_v7 = vadd.f32 %v3288_v9, %v1119_v59 }
 0x80e   :  { %2289 = vmatmul.mubr.f32.vlgmr.msra.gmra.mrb[22].mxu0 %v3296_v24  ;;  %1410 = vmatprep.mubr.f32.mxu1 %v2923_v18  ;;  %v1115_v18 = vrot.slane %v1106_v26, %v1114_v31  ;;  %v2654_v35 = vadd.f32 %v1328_v33, %v1111_v32  ;;  %v2626_v26 = vpack.c.bf16 %v1561_v27, %v1560_v28  ;;  %v1562_v31 = vld [vmem:[#allocation12 + $0x20] sm:$0xff]  ;;  %v1563_v32 = vld [vmem:[#allocation12 + $0x28] sm:$0xff]  ;;  %v1564_v33 = vld [vmem:[#allocation12 + $0x30] sm:$0xff] }
 0x810   :  { %v2656_v36 = vadd.f32 %v1332_v34, %v1115_v18  ;;  %v1565_v18 = vld [vmem:[#allocation12 + $0x38] sm:$0xff] }
 0x811   :  { %1411 = vmatmul.mubr.f32.gmra.mrb[16].mxu1 %v3296_v24  ;;  %v2634_v34 = vpack.c.bf16 %v1565_v18, %v1564_v33 }
 0x8e0   :  { %v1406_v37 = vpop.f32.mrb[14].mxu1 }
 0x8e1   :  { %v2655_v38 = vadd.f32 %v2654_v35, %v1406_v37  ;;  %v1408_v39 = vpop.f32.mrb[15].mxu1  ;;  %v2290_v40 = vpop.f32.mrb[22].mxu0  ;;  %v1567_v37 = vld [vmem:[#allocation12 + $0x48] sm:$0xff] }
 0x8e2   :  { %v1483_v44 = vpop.f32.mrb[23].mxu0  ;;  %v2657_v15 = vadd.f32 %v2656_v36, %v1408_v39  ;;  %v1489_v2 = vadd.f32 %v2290_v40, %v1336_v57  ;;  %v1569_v39 = vld [vmem:[#allocation12 + $0x58] sm:$0xff] }
 0x8e3   :  { %v1824_v45 = vmul.f32 -1.442695, %v2655_v38  ;;  %v1484_v61 = vadd.f32 %v1483_v44, %v1336_v57  ;;  %v1568_v38 = vld [vmem:[#allocation12 + $0x50] sm:$0xff]  ;;  %v1570_v44 = vld [vmem:[#allocation12 + $0x60] sm:$0xff] }
 0x8e4   :  { %v1412_v48 = vpop.f32.mrb[16].mxu1  ;;  %v1826_v51 = vmul.f32 -1.442695, %v2657_v15  ;;  %v2642_v40 = vpack.c.bf16 %v1569_v39, %v1568_v38 }
 0x8e5   :  { %2690 = vpow2.f32 %v1824_v45  ;;  %v2659_v49 = vadd.f32 %v2654_v35, %v1412_v48  ;;  %v1414_v46 = vpop.f32.mrb[17].mxu1  ;;  %v1566_v35 = vld [vmem:[#allocation12 + $0x40] sm:$0xff]  ;;  %v1571_v45 = vld [vmem:[#allocation12 + $0x68] sm:$0xff]  ;;  %v1572_v48 = vld [vmem:[#allocation12 + $0x70] sm:$0xff] }
 0x8e6   :  { %v2661_v30 = vadd.f32 %v2656_v36, %v1414_v46  ;;  %v2638_v36 = vpack.c.bf16 %v1567_v37, %v1566_v35  ;;  %v2646_v15 = vpack.c.bf16 %v1571_v45, %v1570_v44 }
 0x8e7   :  { %v1825_v50 = vmul.f32 -1.442695, %v2659_v49  ;;  %v1573_v49 = vld [vmem:[#allocation12 + $0x78] sm:$0xff] }
 0x8e8   :  { %v1827_v41 = vmul.f32 -1.442695, %v2661_v30  ;;  %v2650_v46 = vpack.c.bf16 %v1573_v49, %v1572_v48 }
 0x8e9   :  { %2692 = vpow2.f32 %v1825_v50 }
 0x8ea   :  { %2694 = vpow2.f32 %v1826_v51 }
 0x8eb   :  { %2696 = vpow2.f32 %v1827_v41 }
 0x8ef   :  { %v2691_v52 = vpop.eup %2690 }
 0x8f0   :  { %v1500_v42 = vadd.f32 1.0, %v2691_v52 }
 0x8f2   :  { %2698 = vrcp.f32 %v1500_v42 }
 0x8f3   :  { %v2693_v53 = vpop.eup %2692 }
 0x8f4   :  { %v1501_v54 = vadd.f32 1.0, %v2693_v53  ;;  %v2695_v56 = vpop.eup %2694 }
 0x8f5   :  { %v2697_v58 = vpop.eup %2696  ;;  %v1514_v60 = vadd.f32 1.0, %v2695_v56 }
 0x8f6   :  { %2700 = vrcp.f32 %v1501_v54  ;;  %v1515_v63 = vadd.f32 1.0, %v2697_v58 }
 0x8f7   :  { %2702 = vrcp.f32 %v1514_v60 }
 0x8f8   :  { %2704 = vrcp.f32 %v1515_v63 }
 0x8fc   :  { %v2699_v62 = vpop.eup %2698 }
 0x8fd   :  { %v1520_v1 = vmul.f32 %v2699_v62, %v1484_v61 }
 0x8ff   :  { %v1522_v6 = vadd.f32 %v1520_v1, %v1267_v0 }
 0x900   :  { %v2701_v47 = vpop.eup %2700 }
 0x901   :  { %2706 = vtanh.f32 %v1522_v6  ;;  %v1521_v43 = vmul.f32 %v2701_v47, %v1489_v2  ;;  %v2703_v4 = vpop.eup %2702 }
 0x902   :  { %v2705_v8 = vpop.eup %2704  ;;  %v1526_v5 = vsub.f32 1.0, %v2703_v4  ;;  %v1530_v13 = vmul.f32 %v2703_v4, %v3293_v23  ;;  %v2622_v23 = vpack.c.bf16 %v1559_v25, %v1558_v22 }
 0x903   :  { %v1523_v3 = vadd.f32 %v1521_v43, %v1272_v7  ;;  %v1527_v14 = vsub.f32 1.0, %v2705_v8  ;;  %v1531_v9 = vmul.f32 %v2705_v8, %v3296_v24  ;;  %v2630_v24 = vpack.c.bf16 %v1563_v32, %v1562_v31 }
 0x904   :  { %2623 = vmatprep.subr.bf16.mxu1 %v2622_v23 }
 0x905   :  { %2708 = vtanh.f32 %v1523_v3  ;;  %2625 = vmatpush3.bf16.msra.mxu1 %v2622_v23 }
 0x906   :  { %2627 = vmatprep.subr.bf16.mxu1 %v2626_v26 }
 0x909   :  { %2629 = vmatpush3.bf16.msra.mxu1 %v2626_v26 }
 0x90a   :  { %2631 = vmatprep.subr.bf16.mxu1 %v2630_v24 }
 0x90b   :  { %v2707_v11 = vpop.eup %2706 }
 0x90c   :  { %v1528_v12 = vmul.f32 %v2707_v11, %v1526_v5 }
 0x90d   :  { %2633 = vmatpush3.bf16.msra.mxu1 %v2630_v24 }
 0x90e   :  { %v3316_v10 = vadd.f32 %v1530_v13, %v1528_v12  ;;  %2635 = vmatprep.subr.bf16.mxu1 %v2634_v34 }
 0x90f   :  { %v2709_v16 = vpop.eup %2708 }
 0x910   :  { %v1534_v17 = vmul.f32 %v3316_v10, %v3316_v10  ;;  %v1529_v19 = vmul.f32 %v2709_v16, %v1527_v14 }
 0x911   :  { %2637 = vmatpush3.bf16.msra.mxu1 %v2634_v34 }
 0x912   :  { %1536 = vadd.xlane.f32.xlu0 %v1534_v17  ;;  %v3321_v20 = vadd.f32 %v1531_v9, %v1529_v19  ;;  %2639 = vmatprep.subr.bf16.mxu1 %v2638_v36 }
 0x914   :  { %v1535_v21 = vmul.f32 %v3321_v20, %v3321_v20 }
 0x915   :  { %2641 = vmatpush3.bf16.msra.mxu1 %v2638_v36 }
 0x916   :  { %1538 = vadd.xlane.f32.xlu1 %v1535_v21  ;;  %2643 = vmatprep.subr.bf16.mxu1 %v2642_v40 }
 0x919   :  { %2645 = vmatpush3.bf16.msra.mxu1 %v2642_v40 }
 0x91a   :  { %2647 = vmatprep.subr.bf16.mxu1 %v2646_v15 }
 0x91d   :  { %2649 = vmatpush3.bf16.msra.mxu1 %v2646_v15 }
 0x91e   :  { %2651 = vmatprep.subr.bf16.mxu1 %v2650_v46 }
 0x921   :  { %2653 = vmatpush3.bf16.msra.mxu1 %v2650_v46 }
 0x99f   :  { %v1537_v50 = vpop.xlane.xlu0 %1536 }
 0x9a0   :  { %v1540_v30 = vmax.f32 %v1537_v50, 1e-30 }
 0x9a2   :  { %2710 = vrsqrt.f32 %v1540_v30  ;;  %v1725_v30 = vld [vmem:[%s3352_s14] sm:$0x1] }
 0x9a3   :  { %v1539_v51 = vpop.xlane.xlu1 %1538 }
 0x9a4   :  { %v1541_v41 = vmax.f32 %v1539_v51, 1e-30 }
 0x9a6   :  { %2712 = vrsqrt.f32 %v1541_v41 }
 0x9ac   :  { %v2711_v52 = vpop.eup %2710 }
 0x9ad   :  { %v1544_v42 = vmul.f32 %v2711_v52, %v1537_v50 }
 0x9af   :  { %v1546_v53 = vmax.f32 %v1544_v42, 1e-15 }
 0x9b0   :  { %v2713_v54 = vpop.eup %2712 }
 0x9b1   :  { %2714 = vtanh.f32 %v1546_v53  ;;  %v1545_v55 = vmul.f32 %v2713_v54, %v1539_v51  ;;  %v1732_v51 = vmul.f32 %v1725_v30, %v1725_v30 }
 0x9b3   :  { %v1547_v56 = vmax.f32 %v1545_v55, 1e-15  ;;  %v1734_v41 = vsel %vm1733_vm3, %v1732_v51, 0.0 }
 0x9b5   :  { %2716 = vtanh.f32 %v1547_v56 }
 0x9bb   :  { %v2715_v57 = vpop.eup %2714 }
 0x9bc   :  { %v1550_v58 = vmin.f32 %v2715_v57, 0.996 }
 0x9be   :  { %v1552_v59 = vmul.f32 %v2711_v52, %v1550_v58  ;;  %v1556_v43 = vmax.f32 %v1550_v58, 1e-15 }
 0x9bf   :  { %v2717_v60 = vpop.eup %2716 }
 0x9c0   :  { %v1551_v61 = vmin.f32 %v2717_v60, 0.996  ;;  %v1554_v62 = vmul.f32 %v1552_v59, %v3316_v10  ;;  %v1673_v4 = vsub.f32 1.0, %v1556_v43  ;;  %v1671_v12 = vadd.f32 1.0, %v1556_v43 }
 0x9c1   :  { %v1741_v60 = vrot.slane %v1725_v30, %v3303_v29 }
 0x9c2   :  { %v1553_v63 = vmul.f32 %v2713_v54, %v1551_v61  ;;  %2323 = vmatprep.mubr.f32.mxu1 %v1554_v62  ;;  %v1557_v7 = vmax.f32 %v1551_v61, 1e-15 }
 0x9c4   :  { %v1555_v0 = vmul.f32 %v1553_v63, %v3321_v20  ;;  %v1674_v3 = vsub.f32 1.0, %v1557_v7  ;;  %v1672_v11 = vadd.f32 1.0, %v1557_v7 }
 0x9c6   :  { %2324 = vmatmul.mubr.f32.vlgmr.msra.gmra.mrb[18].mxu1 %v1555_v0  ;;  %2718 = vrcp.f32 %v1674_v3 }
 0x9c7   :  { %2720 = vrcp.f32 %v1673_v4 }
 0x9d0   :  { %v2719_v8 = vpop.eup %2718 }
 0x9d1   :  { %v2721_v5 = vpop.eup %2720  ;;  %v1678_v13 = vmul.f32 %v2719_v8, %v1672_v11 }
 0x9d2   :  { %v1676_v10 = vmul.f32 %v2721_v5, %v1671_v12 }
 0x9d3   :  { %2722 = vlog2.f32 %v1678_v13 }
 0x9d4   :  { %2724 = vlog2.f32 %v1676_v10 }
 0x9dd   :  { %v2723_v9 = vpop.eup %2722 }
 0x9de   :  { %v2725_v20 = vpop.eup %2724  ;;  %v1682_v25 = vmul.f32 0.6931472, %v2723_v9 }
 0x9df   :  { %v1680_v28 = vmul.f32 0.6931472, %v2725_v20 }
 0x9e0   :  { %v1684_v33 = vmul.f32 0.5, %v1682_v25 }
 0x9e1   :  { %v1683_v34 = vmul.f32 0.5, %v1680_v28 }
 0xa99   :  { %v2325_v1 = vpop.f32.mrb[18].mxu1 }
 0xa9a   :  { %v1640_v2 = vpop.f32.mrb[19].mxu1  ;;  %v1650_v6 = vmul.f32 %v2325_v1, %v2325_v1 }
 0xa9b   :  { %v1649_v47 = vmul.f32 %v1640_v2, %v1640_v2 }
 0xa9c   :  { %1653 = vadd.xlane.f32.xlu1 %v1650_v6 }
 0xa9d   :  { %1651 = vadd.xlane.f32.xlu0 %v1649_v47 }
 0xb29   :  { %v1654_v14 = vpop.xlane.xlu1 %1653 }
 0xb2a   :  { %v1656_v16 = vmax.f32 %v1654_v14, 1e-30  ;;  %v1652_v17 = vpop.xlane.xlu0 %1651  ;;  %vm1694_vm1 = vcmp.le.f32.partialorder %v1654_v14, 1e-30 }
 0xb2b   :  { %v1655_v19 = vmax.f32 %v1652_v17, 1e-30  ;;  %vm1693_vm2 = vcmp.le.f32.partialorder %v1652_v17, 1e-30 }
 0xb2c   :  { %2726 = vrsqrt.f32 %v1656_v16 }
 0xb2d   :  { %2728 = vrsqrt.f32 %v1655_v19 }
 0xb2e   :  { %2730 = vrcp.f32 %v1557_v7 }
 0xb2f   :  { %2732 = vrcp.f32 %v1556_v43 }
 0xb36   :  { %v2727_v21 = vpop.eup %2726 }
 0xb37   :  { %v2729_v22 = vpop.eup %2728  ;;  %v1660_v23 = vmul.f32 %v2727_v21, %v1654_v14 }
 0xb38   :  { %v1659_v27 = vmul.f32 %v2729_v22, %v1652_v17  ;;  %v2731_v31 = vpop.eup %2730 }
 0xb39   :  { %v1662_v26 = vmax.f32 %v1660_v23, 1e-15  ;;  %v2733_v24 = vpop.eup %2732 }
 0xb3a   :  { %v1661_v32 = vmax.f32 %v1659_v27, 1e-15 }
 0xb3b   :  { %v1666_v18 = vmul.f32 %v2731_v31, %v1662_v26 }
 0xb3c   :  { %v1664_v35 = vmul.f32 %v2733_v24, %v1661_v32 }
 0xb3d   :  { %v1686_v37 = vmul.f32 %v1684_v33, %v1666_v18 }
 0xb3e   :  { %v1685_v36 = vmul.f32 %v1683_v34, %v1664_v35 }
 0xb3f   :  { %2734 = vtanh.f32 %v1686_v37 }
 0xb40   :  { %2736 = vtanh.f32 %v1685_v36 }
 0xb49   :  { %v2735_v38 = vpop.eup %2734 }
 0xb4a   :  { %v2737_v39 = vpop.eup %2736  ;;  %v1690_v40 = vmul.f32 %v2735_v38, %v2325_v1 }
 0xb4b   :  { %v1689_v44 = vmul.f32 %v2737_v39, %v1640_v2 }
 0xb4c   :  { %v1692_v45 = vmul.f32 %v2727_v21, %v1690_v40 }
 0xb4d   :  { %v1691_v15 = vmul.f32 %v2729_v22, %v1689_v44 }
 0xb4e   :  { %v1700_v48 = vsel %vm1694_vm1, 0.0, %v1692_v45 }
 0xb4f   :  { %v1702_v49 = vmul.f32 %v1700_v48, %v1700_v48  ;;  %v1699_v46 = vsel %vm1693_vm2, 0.0, %v1691_v15 }
 0xb50   :  { %v1701_v50 = vmul.f32 %v1699_v46, %v1699_v46 }
 0xb51   :  { %1705 = vadd.xlane.f32.xlu1 %v1702_v49 }
 0xb52   :  { %1703 = vadd.xlane.f32.xlu0 %v1701_v50 }
 0xb56   :  { %1735 = vadd.xlane.f32.xlu0 %v1734_v41 }
 0xbde   :  { %v1706_v52 = vpop.xlane.xlu1 %1705 }
 0xbdf   :  { %v1708_v42 = vmax.f32 %v1706_v52, 1e-30  ;;  %v1704_v53 = vpop.xlane.xlu0 %1703 }
 0xbe0   :  { %v1707_v54 = vmax.f32 %v1704_v53, 1e-30 }
 0xbe1   :  { %2738 = vrsqrt.f32 %v1708_v42 }
 0xbe2   :  { %2740 = vrsqrt.f32 %v1707_v54 }
 0xbe3   :  { %v1736_v43 = vpop.xlane.xlu0 %1735 }
 0xbe4   :  { %v1756_v11 = vrot.slane %v1736_v43, %v3303_v29 }
 0xbeb   :  { %v2739_v55 = vpop.eup %2738 }
 0xbec   :  { %v2741_v56 = vpop.eup %2740  ;;  %v1712_v57 = vmul.f32 %v2739_v55, %v1706_v52  ;;  %v1716_v58 = vmul.f32 0.996, %v2739_v55 }
 0xbed   :  { %v1711_v59 = vmul.f32 %v2741_v56, %v1704_v53  ;;  %v1715_v61 = vmul.f32 0.996, %v2741_v56 }
 0xbee   :  { %vm1714_vm4 = vcmp.gt.f32.partialorder %v1712_v57, 0.996  ;;  %v1718_v62 = vmul.f32 %v1716_v58, %v1700_v48 }
 0xbef   :  { %vm1713_vm5 = vcmp.gt.f32.partialorder %v1711_v59, 0.996  ;;  %v1717_v63 = vmul.f32 %v1715_v61, %v1699_v46 }
 0xbf0   :  { %v1724_v0 = vsel %vm1714_vm4, %v1718_v62, %v1700_v48 }
 0xbf1   :  { %v1744_v1 = vmul.f32 %v1741_v60, %v1724_v0  ;;  %v1723_v2 = vsel %vm1713_vm5, %v1717_v63, %v1699_v46  ;;  %v1727_v47 = vmul.f32 %v1724_v0, %v1724_v0 }
 0xbf2   :  { %v1743_v6 = vmul.f32 %v1741_v60, %v1723_v2  ;;  %v1726_v7 = vmul.f32 %v1723_v2, %v1723_v2 }
 0xbf3   :  { %1747 = vadd.xlane.f32.xlu0 %v1744_v1 }
 0xbf4   :  { %1745 = vadd.xlane.f32.xlu1 %v1743_v6 }
 0xbf7   :  { %1730 = vadd.xlane.f32.xlu0 %v1727_v47 }
 0xbf8   :  { %1728 = vadd.xlane.f32.xlu1 %v1726_v7 }
 0xc80   :  { %v1748_v3 = vpop.xlane.xlu0 %1747 }
 0xc81   :  { %v1750_v4 = vmul.f32 2.0, %v1748_v3  ;;  %v1746_v8 = vpop.xlane.xlu1 %1745 }
 0xc82   :  { %v1749_v5 = vmul.f32 2.0, %v1746_v8 }
 0xc83   :  { %v1752_v13 = vadd.f32 1.0, %v1750_v4 }
 0xc84   :  { %v1731_v12 = vpop.xlane.xlu0 %1730  ;;  %v1751_v16 = vadd.f32 1.0, %v1749_v5 }
 0xc85   :  { %v1768_v10 = vmul.f32 %v1756_v11, %v1731_v12  ;;  %v1729_v14 = vpop.xlane.xlu1 %1728  ;;  %v1758_v22 = vadd.f32 %v1756_v11, %v1752_v13  ;;  %v1762_v25 = vsub.f32 1.0, %v1731_v12 }
 0xc86   :  { %v1767_v17 = vmul.f32 %v1756_v11, %v1729_v14  ;;  %v1757_v23 = vadd.f32 %v1756_v11, %v1751_v16  ;;  %v1761_v28 = vsub.f32 1.0, %v1729_v14 }
 0xc87   :  { %v1770_v19 = vadd.f32 %v1768_v10, %v1752_v13  ;;  %v1760_v27 = vmul.f32 %v1758_v22, %v1724_v0  ;;  %v1764_v26 = vmul.f32 %v1762_v25, %v1741_v60 }
 0xc88   :  { %v1769_v9 = vadd.f32 %v1767_v17, %v1751_v16  ;;  %v1759_v31 = vmul.f32 %v1757_v23, %v1723_v2  ;;  %v1763_v29 = vmul.f32 %v1761_v28, %v1741_v60 }
 0xc89   :  { %v1772_v20 = vmax.f32 %v1770_v19, 1e-15  ;;  %v1766_v32 = vadd.f32 %v1764_v26, %v1760_v27 }
 0xc8a   :  { %v1771_v21 = vmax.f32 %v1769_v9, 1e-15  ;;  %v1765_v33 = vadd.f32 %v1763_v29, %v1759_v31 }
 0xc8b   :  { %2742 = vrcp.f32 %v1772_v20 }
 0xc8c   :  { %2744 = vrcp.f32 %v1771_v21 }
 0xc95   :  { %v2743_v24 = vpop.eup %2742 }
 0xc96   :  { %v2745_v18 = vpop.eup %2744  ;;  %v1778_v34 = vmul.f32 %v2743_v24, %v1766_v32 }
 0xc97   :  { %v1777_v35 = vmul.f32 %v2745_v18, %v1765_v33 }
 0xc98   :  { %v1780_v37 = vmul.f32 %v1778_v34, %v1778_v34 }
 0xc99   :  { %v1779_v36 = vmul.f32 %v1777_v35, %v1777_v35 }
 0xc9a   :  { %1783 = vadd.xlane.f32.xlu0 %v1780_v37 }
 0xc9b   :  { %1781 = vadd.xlane.f32.xlu1 %v1779_v36 }
 0xd27   :  { %v1784_v38 = vpop.xlane.xlu0 %1783 }
 0xd28   :  { %v1786_v39 = vmax.f32 %v1784_v38, 1e-30  ;;  %v1782_v40 = vpop.xlane.xlu1 %1781 }
 0xd29   :  { %v1785_v44 = vmax.f32 %v1782_v40, 1e-30 }
 0xd2a   :  { %2746 = vrsqrt.f32 %v1786_v39 }
 0xd2b   :  { %2748 = vrsqrt.f32 %v1785_v44 }
 0xd34   :  { %v2747_v45 = vpop.eup %2746 }
 0xd35   :  { %v2749_v15 = vpop.eup %2748  ;;  %v1790_v48 = vmul.f32 %v2747_v45, %v1784_v38  ;;  %v1794_v49 = vmul.f32 0.996, %v2747_v45 }
 0xd36   :  { %v1789_v46 = vmul.f32 %v2749_v15, %v1782_v40  ;;  %v1793_v50 = vmul.f32 0.996, %v2749_v15 }
 0xd37   :  { %vm1792_vm6 = vcmp.gt.f32.partialorder %v1790_v48, 0.996  ;;  %v1796_v30 = vmul.f32 %v1794_v49, %v1778_v34 }
 0xd38   :  { %vm1791_vm7 = vcmp.gt.f32.partialorder %v1789_v46, 0.996  ;;  %v1795_v51 = vmul.f32 %v1793_v50, %v1777_v35 }
 0xd39   :  { %v1802_v41 = vsel %vm1792_vm6, %v1796_v30, %v1778_v34 }
 0xd3a   :  { %1804 = vst [vmem:[%s3353_s15 + $0x8] sm:$0xff] %v1802_v41  ;;  %v1801_v52 = vsel %vm1791_vm7, %v1795_v51, %v1777_v35 }
 0xd3b   :  { %1803 = vst [vmem:[%s3353_s15] sm:$0xff] %v1801_v52 }
 0xd3c   :  { %1809 = vsyncpa [#allocation3], 1 }
 0xd3d   :  { %1810 = vsyncpa [#allocation5], 1 }
 0xd3e   :  { %1811 = vsyncpa [#allocation8], 1 }
 0xd3f   :  { %1812 = vsyncpa [#allocation11], 1 }

</bundles_post_ra>
